<compile_context>
chip_gen: v6e
topology: v6e:2x2x1
jax: 0.10.0
libtpu: 0.0.40
codegen_flags: <defaults>
</compile_context>

<pallas_src>
import functools

import jax
import jax.numpy as jnp
from jax import lax
from jax.experimental import pallas as pl
from jax.experimental.pallas import tpu as pltpu


# ----------------------------------------------------------------------------
# Config (stands in for cfg.* of the original repo) -- small, deterministic.
# ----------------------------------------------------------------------------
DIM_INNER = 16      # cfg.gnn.dim_inner  (also edge_channels)
ATTN_HEADS = 2      # cfg.gnn.attn_heads
NUM_LAYERS = 3      # cfg.gnn.layers_mp
NUM_CLASSES = 4     # dim_out
NUM_ETYPES = 3
NEG_SLOPE = 0.05
RESIDUAL = True     # cfg.gnn.residual
L2NORM = True       # cfg.gnn.l2norm
EPSILON = 1e-12


# ----------------------------------------------------------------------------
# Fused Pallas kernel: all layers + finalize in one launch
# ----------------------------------------------------------------------------
def _shgn_fused_kernel(x_ref, row_oh_ref, col_oh_ref, ee_ref, *w_and_out,
                       H, layer_cfg, slope, eps, l2norm, num_classes):
    """Whole SHGN forward.

    x_ref      : (N, dim_inner)   pre-encoded node features
    row_oh_ref : (E, N) bf16      one-hot of source nodes
    col_oh_ref : (E, N) bf16      one-hot of destination nodes
    ee_ref     : (E, L*H) f32     precomputed per-edge attention-edge scalars per layer
    w_and_out  : L folded weight refs (cin_l, W_l) + output ref (N, num_classes)
    layer_cfg  : static tuple of (out_channels, residual) per layer
    """
    f32 = jnp.float32
    w_refs = w_and_out[:-1]
    out_ref = w_and_out[-1]

    row_oh = row_oh_ref[...].astype(f32)       # (E, N)
    col_oh = col_oh_ref[...].astype(f32)       # (E, N)
    ee_all = ee_ref[...]                       # (E, L*H)
    col_mask = col_oh > 0

    h = x_ref[...]                             # (N, cin_0)
    for l, (C, residual) in enumerate(layer_cfg):
        W = w_refs[l][...]                     # (cin, H*C + 2H [+ H*C])
        # One matmul gives hf | al_node | ar_node | (residual)
        z = jnp.dot(h, W, preferred_element_type=f32)            # (N, width)
        ar_node = z[:, H * C + H:H * C + 2 * H]                  # (N, H)

        # Batched gather onto edges: [h_src | al_e] in one MXU pass over row_oh.
        row_in = z[:, :H * C + H]                                 # (N, H*C+H)
        row_g = jnp.dot(row_oh, row_in, preferred_element_type=f32)   # (E, H*C+H)
        h_src = row_g[:, :H * C]                                  # (E, H*C)
        al_e = row_g[:, H * C:]                                   # (E, H)
        ar_e = jnp.dot(col_oh, ar_node, preferred_element_type=f32)   # (E, H)

        ee = ee_all[:, l * H:(l + 1) * H]                         # (E, H)
        a = al_e + ar_e + ee
        a = jnp.where(a > 0, a, slope * a)                        # leaky_relu

        # PyG-style segment softmax over destination node (col), batched across heads.
        seg_max_rows = []
        for hd in range(H):
            masked = jnp.where(col_mask, a[:, hd:hd + 1], -1e30)  # (E, N)
            seg_max_rows.append(jnp.max(masked, axis=0, keepdims=True))  # (1, N)
        seg_max_hn = jnp.concatenate(seg_max_rows, axis=0)        # (H, N)
        # per-edge segment max: col_oh @ seg_max^T           -> (E, H)
        seg_max_e = lax.dot_general(col_oh, seg_max_hn,
                                    (((1,), (1,)), ((), ())),
                                    preferred_element_type=f32)
        p = jnp.exp(a - seg_max_e)                                # (E, H)
        # per-destination sum: col_oh^T @ p                   -> (N, H)
        denom_n = lax.dot_general(col_oh, p,
                                  (((0,), (0,)), ((), ())),
                                  preferred_element_type=f32)
        # back to edges: col_oh @ denom_n                      -> (E, H)
        denom_e = jnp.dot(col_oh, denom_n, preferred_element_type=f32)
        alpha = p / (denom_e + 1e-16)                             # (E, H)

        # messages for all heads, then one scatter-add: col_oh^T @ msg -> (N, H*C)
        msg = jnp.concatenate(
            [alpha[:, hd:hd + 1] * h_src[:, hd * C:(hd + 1) * C] for hd in range(H)],
            axis=1)                                               # (E, H*C)
        out = lax.dot_general(col_oh, msg, (((0,), (0,)), ((), ())),
                              preferred_element_type=f32)         # (N, H*C)

        if residual:
            out = out + z[:, H * C + 2 * H:]                      # res_fc(h)
        # ELU
        out = jnp.where(out > 0, out, jnp.exp(jnp.minimum(out, 0.0)) - 1.0)
        h = out                                                   # (N, H*C) -> next layer

    # Finalize: mean over heads, optional row-wise L2 normalization.
    nc = num_classes
    acc = h[:, 0:nc]
    for hd in range(1, H):
        acc = acc + h[:, hd * nc:(hd + 1) * nc]
    mean = acc * (1.0 / H)
    if l2norm:
        norm = jnp.sqrt(jnp.sum(mean * mean, axis=1, keepdims=True))
        mean = mean / jnp.maximum(norm, eps)
    out_ref[...] = mean


def shgn_fused_call(x, row_oh, col_oh, ee_all, w_list, *, H, layer_cfg):
    N = x.shape[0]
    kern = functools.partial(_shgn_fused_kernel, H=H, layer_cfg=layer_cfg,
                             slope=NEG_SLOPE, eps=EPSILON, l2norm=L2NORM,
                             num_classes=NUM_CLASSES)
    in_arrays = [x, row_oh, col_oh, ee_all] + list(w_list)
    in_specs = [pl.BlockSpec(a.shape, lambda i: (0, 0)) for a in in_arrays]
    return pl.pallas_call(
        kern,
        out_shape=jax.ShapeDtypeStruct((N, NUM_CLASSES), jnp.float32),
        grid=(1,),
        in_specs=in_specs,
        out_specs=pl.BlockSpec((N, NUM_CLASSES), lambda i: (0, 0)),
        compiler_params=pltpu.CompilerParams(dimension_semantics=("arbitrary",)),
    )(*in_arrays)


# ----------------------------------------------------------------------------
# Parameter initialization (deterministic, xavier_normal with relu gain)
# ----------------------------------------------------------------------------
def xavier_normal(key, shape, gain):
    fan_in, fan_out = shape[0], shape[1]
    std = gain * (2.0 / (fan_in + fan_out)) ** 0.5
    return std * jax.random.normal(key, shape, jnp.float32)


def init_shgn_params(key):
    gain = 2.0 ** 0.5  # calculate_gain('relu')
    H, EC = ATTN_HEADS, DIM_INNER
    layer_dims = []
    layer_dims.append((DIM_INNER, DIM_INNER, False))                    # layer 0
    for _ in range(1, NUM_LAYERS - 1):
        layer_dims.append((DIM_INNER * H, DIM_INNER, RESIDUAL))         # middle
    layer_dims.append((DIM_INNER * H, NUM_CLASSES, RESIDUAL))           # last

    params = []
    for (cin, cout, residual) in layer_dims:
        key, k1, k2, k3, k4, k5, k6, k7 = jax.random.split(key, 8)
        p = {
            # weights stored pre-transposed: y = x @ W, W: (in, out)
            "W_fc": xavier_normal(k1, (cin, H * cout), gain),
            "W_fce": xavier_normal(k2, (EC, H * EC), gain),
            "attn_l": xavier_normal(k3, (H, cout), gain),
            "attn_r": xavier_normal(k4, (H, cout), gain),
            "attn_e": xavier_normal(k5, (H, EC), gain),
            "emb": jax.random.normal(k6, (NUM_ETYPES, EC), jnp.float32),  # nn.Embedding N(0,1)
            "residual": residual,
            "cout": cout,
        }
        if residual:
            p["W_res"] = xavier_normal(k7, (cin, H * cout), gain)
        params.append(p)
    return params


# ----------------------------------------------------------------------------
# Parameter folding (outside the kernel; pure param / edge-type algebra)
# ----------------------------------------------------------------------------
def fold_params(params, edge_type, H):
    """Returns per-layer big weights and the (E, L*H) per-edge attention-edge scalars."""
    w_list = []
    ee_cols = []
    for p in params:
        cin = p["W_fc"].shape[0]
        C = p["cout"]
        W_fc_r = p["W_fc"].reshape(cin, H, C)
        W_al = jnp.einsum("khc,hc->kh", W_fc_r, p["attn_l"])    # (cin, H)
        W_ar = jnp.einsum("khc,hc->kh", W_fc_r, p["attn_r"])    # (cin, H)
        parts = [p["W_fc"], W_al, W_ar]
        if p["residual"]:
            parts.append(p["W_res"])
        w_list.append(jnp.concatenate(parts, axis=1))           # (cin, H*C+2H[+H*C])

        # ee_table[t, h] = <fc_e(emb[t])_h, attn_e_h>  -> gather by edge type
        e_feat_t = (p["emb"] @ p["W_fce"]).reshape(NUM_ETYPES, H, DIM_INNER)
        ee_table = jnp.einsum("thc,hc->th", e_feat_t, p["attn_e"])   # (T, H)
        ee_cols.append(ee_table[edge_type])                          # (E, H)
    ee_all = jnp.concatenate(ee_cols, axis=1).astype(jnp.float32)    # (E, L*H)
    layer_cfg = tuple((p["cout"], p["residual"]) for p in params)
    return w_list, ee_all, layer_cfg


# ----------------------------------------------------------------------------
# Driver
# ----------------------------------------------------------------------------
if __name__ == "__main__":
    key = jax.random.PRNGKey(0)
    N, E = 12, 16
    H = ATTN_HEADS

    key, kx, ke_src, ke_dst, ket, ky = jax.random.split(key, 6)
    x = jax.random.normal(kx, (N, DIM_INNER), jnp.float32)
    x = jnp.nan_to_num(x)                                   # matches x.nan_to_num()
    row = jax.random.randint(ke_src, (E,), 0, N)            # source nodes
    col = jax.random.randint(ke_dst, (E,), 0, N)            # destination nodes
    edge_type = jax.random.randint(ket, (E,), 0, NUM_ETYPES)
    label = jax.random.randint(ky, (N,), 0, NUM_CLASSES)

    # dense graph-structure encodings (bf16: exact for 0/1, halves DMA bytes)
    row_oh = jax.nn.one_hot(row, N, dtype=jnp.bfloat16)     # (E, N)
    col_oh = jax.nn.one_hot(col, N, dtype=jnp.bfloat16)     # (E, N)

    params = init_shgn_params(jax.random.PRNGKey(42))
    w_list, ee_all, layer_cfg = fold_params(params, edge_type, H)

    fwd = jax.jit(lambda xx: shgn_fused_call(
        xx, row_oh, col_oh, ee_all, w_list, H=H, layer_cfg=layer_cfg))
    logits = fwd(x)
    jax.block_until_ready(logits)

    # split-mask selection (glue; equivalent to logits[batch[mask]], label[batch[mask]])
    train_mask = jnp.arange(N) < 6
    sel_logits = logits[train_mask]
    sel_label = label[train_mask]
    jax.block_until_ready((sel_logits, sel_label))

    assert sel_logits.shape == (6, NUM_CLASSES)
    assert bool(jnp.all(jnp.isfinite(sel_logits)))
    print("KERNEL_OK")
</pallas_src>

<mosaic_0001>
module attributes {stable_mosaic.version = 11 : i64} {
  func.func @_shgn_fused_kernel(%arg0: i32, %arg1: memref<12x16xf32, #tpu.memory_space<vmem>>, %arg2: memref<16x12xbf16, #tpu.memory_space<vmem>>, %arg3: memref<16x12xbf16, #tpu.memory_space<vmem>>, %arg4: memref<16x6xf32, #tpu.memory_space<vmem>>, %arg5: memref<16x36xf32, #tpu.memory_space<vmem>>, %arg6: memref<32x68xf32, #tpu.memory_space<vmem>>, %arg7: memref<32x20xf32, #tpu.memory_space<vmem>>, %arg8: memref<12x4xf32, #tpu.memory_space<vmem>>) attributes {dimension_semantics = [#tpu.dimension_semantics<arbitrary>], iteration_bounds = array<i64: 1>, scalar_prefetch = 0 : i64, scratch_operands = 0 : i64, tpu.core_type = #tpu.core_type<tc>, window_params = [{pipeline_mode = #tpu.pipeline_mode<synchronous>, transform_indices = @transform_0, window_bounds = array<i64: 12, 16>}, {pipeline_mode = #tpu.pipeline_mode<synchronous>, transform_indices = @transform_1, window_bounds = array<i64: 16, 12>}, {pipeline_mode = #tpu.pipeline_mode<synchronous>, transform_indices = @transform_2, window_bounds = array<i64: 16, 12>}, {pipeline_mode = #tpu.pipeline_mode<synchronous>, transform_indices = @transform_3, window_bounds = array<i64: 16, 6>}, {pipeline_mode = #tpu.pipeline_mode<synchronous>, transform_indices = @transform_4, window_bounds = array<i64: 16, 36>}, {pipeline_mode = #tpu.pipeline_mode<synchronous>, transform_indices = @transform_5, window_bounds = array<i64: 32, 68>}, {pipeline_mode = #tpu.pipeline_mode<synchronous>, transform_indices = @transform_6, window_bounds = array<i64: 32, 20>}, {pipeline_mode = #tpu.pipeline_mode<synchronous>, transform_indices = @transform_7, window_bounds = array<i64: 12, 4>}]} {
    %c0 = arith.constant 0 : index
    %c0_0 = arith.constant 0 : index
    %0 = vector.load %arg2[%c0, %c0_0] : memref<16x12xbf16, #tpu.memory_space<vmem>>, vector<16x12xbf16>
    %1 = arith.extf %0 : vector<16x12xbf16> to vector<16x12xf32>
    %c0_1 = arith.constant 0 : index
    %c0_2 = arith.constant 0 : index
    %2 = vector.load %arg3[%c0_1, %c0_2] : memref<16x12xbf16, #tpu.memory_space<vmem>>, vector<16x12xbf16>
    %3 = arith.extf %2 : vector<16x12xbf16> to vector<16x12xf32>
    %c0_3 = arith.constant 0 : index
    %c0_4 = arith.constant 0 : index
    %4 = vector.load %arg4[%c0_3, %c0_4] : memref<16x6xf32, #tpu.memory_space<vmem>>, vector<16x6xf32>
    %cst = arith.constant 0.000000e+00 : f32
    %5 = vector.broadcast %cst : f32 to vector<16x12xf32>
    %6 = arith.cmpf ogt, %3, %5 : vector<16x12xf32>
    %c0_5 = arith.constant 0 : index
    %c0_6 = arith.constant 0 : index
    %7 = vector.load %arg1[%c0_5, %c0_6] : memref<12x16xf32, #tpu.memory_space<vmem>>, vector<12x16xf32>
    %c0_7 = arith.constant 0 : index
    %c0_8 = arith.constant 0 : index
    %8 = vector.load %arg5[%c0_7, %c0_8] : memref<16x36xf32, #tpu.memory_space<vmem>>, vector<16x36xf32>
    %cst_9 = arith.constant dense<0.000000e+00> : vector<12x36xf32>
    %9 = tpu.matmul %7, %8, %cst_9 {dimension_numbers = #tpu.dot_dimension_numbers<[1], [0], [0], [1], [0, 0, 1, 1], [], []>} : vector<12x16xf32>, vector<16x36xf32>, vector<12x36xf32> -> vector<12x36xf32>
    %10 = vector.extract_strided_slice %9 {offsets = [0, 34], sizes = [12, 2], strides = [1, 1]} : vector<12x36xf32> to vector<12x2xf32>
    %11 = vector.extract_strided_slice %9 {offsets = [0, 0], sizes = [12, 34], strides = [1, 1]} : vector<12x36xf32> to vector<12x34xf32>
    %cst_10 = arith.constant dense<0.000000e+00> : vector<16x34xf32>
    %12 = tpu.matmul %1, %11, %cst_10 {dimension_numbers = #tpu.dot_dimension_numbers<[1], [0], [0], [1], [0, 0, 1, 1], [], []>} : vector<16x12xf32>, vector<12x34xf32>, vector<16x34xf32> -> vector<16x34xf32>
    %13 = vector.extract_strided_slice %12 {offsets = [0, 0], sizes = [16, 32], strides = [1, 1]} : vector<16x34xf32> to vector<16x32xf32>
    %14 = vector.extract_strided_slice %12 {offsets = [0, 32], sizes = [16, 2], strides = [1, 1]} : vector<16x34xf32> to vector<16x2xf32>
    %cst_11 = arith.constant dense<0.000000e+00> : vector<16x2xf32>
    %15 = tpu.matmul %3, %10, %cst_11 {dimension_numbers = #tpu.dot_dimension_numbers<[1], [0], [0], [1], [0, 0, 1, 1], [], []>} : vector<16x12xf32>, vector<12x2xf32>, vector<16x2xf32> -> vector<16x2xf32>
    %16 = vector.extract_strided_slice %4 {offsets = [0, 0], sizes = [16, 2], strides = [1, 1]} : vector<16x6xf32> to vector<16x2xf32>
    %17 = arith.addf %14, %15 : vector<16x2xf32>
    %18 = arith.addf %17, %16 : vector<16x2xf32>
    %cst_12 = arith.constant 0.000000e+00 : f32
    %19 = vector.broadcast %cst_12 : f32 to vector<16x2xf32>
    %20 = arith.cmpf ogt, %18, %19 : vector<16x2xf32>
    %cst_13 = arith.constant 5.000000e-02 : f32
    %21 = vector.broadcast %cst_13 : f32 to vector<16x2xf32>
    %22 = arith.mulf %21, %18 : vector<16x2xf32>
    %23 = arith.select %20, %18, %22 : vector<16x2xi1>, vector<16x2xf32>
    %24 = vector.extract_strided_slice %23 {offsets = [0, 0], sizes = [16, 1], strides = [1, 1]} : vector<16x2xf32> to vector<16x1xf32>
    %cst_14 = arith.constant -1.000000e+30 : f32
    %25 = vector.shape_cast %24 : vector<16x1xf32> to vector<16x1xf32>
    %26 = vector.broadcast %25 : vector<16x1xf32> to vector<16x12xf32>
    %27 = vector.broadcast %cst_14 : f32 to vector<16x12xf32>
    %28 = arith.select %6, %26, %27 : vector<16x12xi1>, vector<16x12xf32>
    %cst_15 = arith.constant dense<0xFF800000> : vector<12xf32>
    %29 = vector.multi_reduction <maximumf>, %28, %cst_15 [0] : vector<16x12xf32> to vector<12xf32>
    %30 = vector.shape_cast %29 : vector<12xf32> to vector<1x12xf32>
    %31 = vector.extract_strided_slice %23 {offsets = [0, 1], sizes = [16, 1], strides = [1, 1]} : vector<16x2xf32> to vector<16x1xf32>
    %cst_16 = arith.constant -1.000000e+30 : f32
    %32 = vector.shape_cast %31 : vector<16x1xf32> to vector<16x1xf32>
    %33 = vector.broadcast %32 : vector<16x1xf32> to vector<16x12xf32>
    %34 = vector.broadcast %cst_16 : f32 to vector<16x12xf32>
    %35 = arith.select %6, %33, %34 : vector<16x12xi1>, vector<16x12xf32>
    %cst_17 = arith.constant dense<0xFF800000> : vector<12xf32>
    %36 = vector.multi_reduction <maximumf>, %35, %cst_17 [0] : vector<16x12xf32> to vector<12xf32>
    %37 = vector.shape_cast %36 : vector<12xf32> to vector<1x12xf32>
    %38 = tpu.concatenate %30, %37 in 0 : vector<1x12xf32>, vector<1x12xf32> -> vector<2x12xf32>
    %cst_18 = arith.constant dense<0.000000e+00> : vector<16x2xf32>
    %39 = tpu.matmul %3, %38, %cst_18 {dimension_numbers = #tpu.dot_dimension_numbers<[1], [1], [0], [0], [0, 0, 1, 0], [], []>} : vector<16x12xf32>, vector<2x12xf32>, vector<16x2xf32> -> vector<16x2xf32>
    %40 = arith.subf %23, %39 : vector<16x2xf32>
    %41 = math.exp %40 : vector<16x2xf32>
    %cst_19 = arith.constant dense<0.000000e+00> : vector<12x2xf32>
    %42 = tpu.matmul %3, %41, %cst_19 {dimension_numbers = #tpu.dot_dimension_numbers<[0], [0], [1], [1], [0, 1, 1, 1], [], []>} : vector<16x12xf32>, vector<16x2xf32>, vector<12x2xf32> -> vector<12x2xf32>
    %cst_20 = arith.constant dense<0.000000e+00> : vector<16x2xf32>
    %43 = tpu.matmul %3, %42, %cst_20 {dimension_numbers = #tpu.dot_dimension_numbers<[1], [0], [0], [1], [0, 0, 1, 1], [], []>} : vector<16x12xf32>, vector<12x2xf32>, vector<16x2xf32> -> vector<16x2xf32>
    %cst_21 = arith.constant 1.000000e-16 : f32
    %44 = vector.broadcast %cst_21 : f32 to vector<16x2xf32>
    %45 = arith.addf %43, %44 : vector<16x2xf32>
    %46 = arith.divf %41, %45 : vector<16x2xf32>
    %47 = vector.extract_strided_slice %46 {offsets = [0, 0], sizes = [16, 1], strides = [1, 1]} : vector<16x2xf32> to vector<16x1xf32>
    %48 = vector.extract_strided_slice %13 {offsets = [0, 0], sizes = [16, 16], strides = [1, 1]} : vector<16x32xf32> to vector<16x16xf32>
    %49 = vector.broadcast %47 : vector<16x1xf32> to vector<16x16xf32>
    %50 = arith.mulf %49, %48 : vector<16x16xf32>
    %51 = vector.extract_strided_slice %46 {offsets = [0, 1], sizes = [16, 1], strides = [1, 1]} : vector<16x2xf32> to vector<16x1xf32>
    %52 = vector.extract_strided_slice %13 {offsets = [0, 16], sizes = [16, 16], strides = [1, 1]} : vector<16x32xf32> to vector<16x16xf32>
    %53 = vector.broadcast %51 : vector<16x1xf32> to vector<16x16xf32>
    %54 = arith.mulf %53, %52 : vector<16x16xf32>
    %55 = tpu.concatenate %50, %54 in 1 : vector<16x16xf32>, vector<16x16xf32> -> vector<16x32xf32>
    %cst_22 = arith.constant dense<0.000000e+00> : vector<12x32xf32>
    %56 = tpu.matmul %3, %55, %cst_22 {dimension_numbers = #tpu.dot_dimension_numbers<[0], [0], [1], [1], [0, 1, 1, 1], [], []>} : vector<16x12xf32>, vector<16x32xf32>, vector<12x32xf32> -> vector<12x32xf32>
    %cst_23 = arith.constant 0.000000e+00 : f32
    %57 = vector.broadcast %cst_23 : f32 to vector<12x32xf32>
    %58 = arith.cmpf ogt, %56, %57 : vector<12x32xf32>
    %cst_24 = arith.constant 0.000000e+00 : f32
    %59 = vector.broadcast %cst_24 : f32 to vector<12x32xf32>
    %60 = arith.minimumf %56, %59 : vector<12x32xf32>
    %61 = math.exp %60 : vector<12x32xf32>
    %cst_25 = arith.constant 1.000000e+00 : f32
    %62 = vector.broadcast %cst_25 : f32 to vector<12x32xf32>
    %63 = arith.subf %61, %62 : vector<12x32xf32>
    %64 = arith.select %58, %56, %63 : vector<12x32xi1>, vector<12x32xf32>
    %c0_26 = arith.constant 0 : index
    %c0_27 = arith.constant 0 : index
    %65 = vector.load %arg6[%c0_26, %c0_27] : memref<32x68xf32, #tpu.memory_space<vmem>>, vector<32x68xf32>
    %cst_28 = arith.constant dense<0.000000e+00> : vector<12x68xf32>
    %66 = tpu.matmul %64, %65, %cst_28 {dimension_numbers = #tpu.dot_dimension_numbers<[1], [0], [0], [1], [0, 0, 1, 1], [], []>} : vector<12x32xf32>, vector<32x68xf32>, vector<12x68xf32> -> vector<12x68xf32>
    %67 = vector.extract_strided_slice %66 {offsets = [0, 34], sizes = [12, 2], strides = [1, 1]} : vector<12x68xf32> to vector<12x2xf32>
    %68 = vector.extract_strided_slice %66 {offsets = [0, 0], sizes = [12, 34], strides = [1, 1]} : vector<12x68xf32> to vector<12x34xf32>
    %cst_29 = arith.constant dense<0.000000e+00> : vector<16x34xf32>
    %69 = tpu.matmul %1, %68, %cst_29 {dimension_numbers = #tpu.dot_dimension_numbers<[1], [0], [0], [1], [0, 0, 1, 1], [], []>} : vector<16x12xf32>, vector<12x34xf32>, vector<16x34xf32> -> vector<16x34xf32>
    %70 = vector.extract_strided_slice %69 {offsets = [0, 0], sizes = [16, 32], strides = [1, 1]} : vector<16x34xf32> to vector<16x32xf32>
    %71 = vector.extract_strided_slice %69 {offsets = [0, 32], sizes = [16, 2], strides = [1, 1]} : vector<16x34xf32> to vector<16x2xf32>
    %cst_30 = arith.constant dense<0.000000e+00> : vector<16x2xf32>
    %72 = tpu.matmul %3, %67, %cst_30 {dimension_numbers = #tpu.dot_dimension_numbers<[1], [0], [0], [1], [0, 0, 1, 1], [], []>} : vector<16x12xf32>, vector<12x2xf32>, vector<16x2xf32> -> vector<16x2xf32>
    %73 = vector.extract_strided_slice %4 {offsets = [0, 2], sizes = [16, 2], strides = [1, 1]} : vector<16x6xf32> to vector<16x2xf32>
    %74 = arith.addf %71, %72 : vector<16x2xf32>
    %75 = arith.addf %74, %73 : vector<16x2xf32>
    %cst_31 = arith.constant 0.000000e+00 : f32
    %76 = vector.broadcast %cst_31 : f32 to vector<16x2xf32>
    %77 = arith.cmpf ogt, %75, %76 : vector<16x2xf32>
    %cst_32 = arith.constant 5.000000e-02 : f32
    %78 = vector.broadcast %cst_32 : f32 to vector<16x2xf32>
    %79 = arith.mulf %78, %75 : vector<16x2xf32>
    %80 = arith.select %77, %75, %79 : vector<16x2xi1>, vector<16x2xf32>
    %81 = vector.extract_strided_slice %80 {offsets = [0, 0], sizes = [16, 1], strides = [1, 1]} : vector<16x2xf32> to vector<16x1xf32>
    %cst_33 = arith.constant -1.000000e+30 : f32
    %82 = vector.shape_cast %81 : vector<16x1xf32> to vector<16x1xf32>
    %83 = vector.broadcast %82 : vector<16x1xf32> to vector<16x12xf32>
    %84 = vector.broadcast %cst_33 : f32 to vector<16x12xf32>
    %85 = arith.select %6, %83, %84 : vector<16x12xi1>, vector<16x12xf32>
    %cst_34 = arith.constant dense<0xFF800000> : vector<12xf32>
    %86 = vector.multi_reduction <maximumf>, %85, %cst_34 [0] : vector<16x12xf32> to vector<12xf32>
    %87 = vector.shape_cast %86 : vector<12xf32> to vector<1x12xf32>
    %88 = vector.extract_strided_slice %80 {offsets = [0, 1], sizes = [16, 1], strides = [1, 1]} : vector<16x2xf32> to vector<16x1xf32>
    %cst_35 = arith.constant -1.000000e+30 : f32
    %89 = vector.shape_cast %88 : vector<16x1xf32> to vector<16x1xf32>
    %90 = vector.broadcast %89 : vector<16x1xf32> to vector<16x12xf32>
    %91 = vector.broadcast %cst_35 : f32 to vector<16x12xf32>
    %92 = arith.select %6, %90, %91 : vector<16x12xi1>, vector<16x12xf32>
    %cst_36 = arith.constant dense<0xFF800000> : vector<12xf32>
    %93 = vector.multi_reduction <maximumf>, %92, %cst_36 [0] : vector<16x12xf32> to vector<12xf32>
    %94 = vector.shape_cast %93 : vector<12xf32> to vector<1x12xf32>
    %95 = tpu.concatenate %87, %94 in 0 : vector<1x12xf32>, vector<1x12xf32> -> vector<2x12xf32>
    %cst_37 = arith.constant dense<0.000000e+00> : vector<16x2xf32>
    %96 = tpu.matmul %3, %95, %cst_37 {dimension_numbers = #tpu.dot_dimension_numbers<[1], [1], [0], [0], [0, 0, 1, 0], [], []>} : vector<16x12xf32>, vector<2x12xf32>, vector<16x2xf32> -> vector<16x2xf32>
    %97 = arith.subf %80, %96 : vector<16x2xf32>
    %98 = math.exp %97 : vector<16x2xf32>
    %cst_38 = arith.constant dense<0.000000e+00> : vector<12x2xf32>
    %99 = tpu.matmul %3, %98, %cst_38 {dimension_numbers = #tpu.dot_dimension_numbers<[0], [0], [1], [1], [0, 1, 1, 1], [], []>} : vector<16x12xf32>, vector<16x2xf32>, vector<12x2xf32> -> vector<12x2xf32>
    %cst_39 = arith.constant dense<0.000000e+00> : vector<16x2xf32>
    %100 = tpu.matmul %3, %99, %cst_39 {dimension_numbers = #tpu.dot_dimension_numbers<[1], [0], [0], [1], [0, 0, 1, 1], [], []>} : vector<16x12xf32>, vector<12x2xf32>, vector<16x2xf32> -> vector<16x2xf32>
    %cst_40 = arith.constant 1.000000e-16 : f32
    %101 = vector.broadcast %cst_40 : f32 to vector<16x2xf32>
    %102 = arith.addf %100, %101 : vector<16x2xf32>
    %103 = arith.divf %98, %102 : vector<16x2xf32>
    %104 = vector.extract_strided_slice %103 {offsets = [0, 0], sizes = [16, 1], strides = [1, 1]} : vector<16x2xf32> to vector<16x1xf32>
    %105 = vector.extract_strided_slice %70 {offsets = [0, 0], sizes = [16, 16], strides = [1, 1]} : vector<16x32xf32> to vector<16x16xf32>
    %106 = vector.broadcast %104 : vector<16x1xf32> to vector<16x16xf32>
    %107 = arith.mulf %106, %105 : vector<16x16xf32>
    %108 = vector.extract_strided_slice %103 {offsets = [0, 1], sizes = [16, 1], strides = [1, 1]} : vector<16x2xf32> to vector<16x1xf32>
    %109 = vector.extract_strided_slice %70 {offsets = [0, 16], sizes = [16, 16], strides = [1, 1]} : vector<16x32xf32> to vector<16x16xf32>
    %110 = vector.broadcast %108 : vector<16x1xf32> to vector<16x16xf32>
    %111 = arith.mulf %110, %109 : vector<16x16xf32>
    %112 = tpu.concatenate %107, %111 in 1 : vector<16x16xf32>, vector<16x16xf32> -> vector<16x32xf32>
    %cst_41 = arith.constant dense<0.000000e+00> : vector<12x32xf32>
    %113 = tpu.matmul %3, %112, %cst_41 {dimension_numbers = #tpu.dot_dimension_numbers<[0], [0], [1], [1], [0, 1, 1, 1], [], []>} : vector<16x12xf32>, vector<16x32xf32>, vector<12x32xf32> -> vector<12x32xf32>
    %114 = vector.extract_strided_slice %66 {offsets = [0, 36], sizes = [12, 32], strides = [1, 1]} : vector<12x68xf32> to vector<12x32xf32>
    %115 = arith.addf %113, %114 : vector<12x32xf32>
    %cst_42 = arith.constant 0.000000e+00 : f32
    %116 = vector.broadcast %cst_42 : f32 to vector<12x32xf32>
    %117 = arith.cmpf ogt, %115, %116 : vector<12x32xf32>
    %cst_43 = arith.constant 0.000000e+00 : f32
    %118 = vector.broadcast %cst_43 : f32 to vector<12x32xf32>
    %119 = arith.minimumf %115, %118 : vector<12x32xf32>
    %120 = math.exp %119 : vector<12x32xf32>
    %cst_44 = arith.constant 1.000000e+00 : f32
    %121 = vector.broadcast %cst_44 : f32 to vector<12x32xf32>
    %122 = arith.subf %120, %121 : vector<12x32xf32>
    %123 = arith.select %117, %115, %122 : vector<12x32xi1>, vector<12x32xf32>
    %c0_45 = arith.constant 0 : index
    %c0_46 = arith.constant 0 : index
    %124 = vector.load %arg7[%c0_45, %c0_46] : memref<32x20xf32, #tpu.memory_space<vmem>>, vector<32x20xf32>
    %cst_47 = arith.constant dense<0.000000e+00> : vector<12x20xf32>
    %125 = tpu.matmul %123, %124, %cst_47 {dimension_numbers = #tpu.dot_dimension_numbers<[1], [0], [0], [1], [0, 0, 1, 1], [], []>} : vector<12x32xf32>, vector<32x20xf32>, vector<12x20xf32> -> vector<12x20xf32>
    %126 = vector.extract_strided_slice %125 {offsets = [0, 10], sizes = [12, 2], strides = [1, 1]} : vector<12x20xf32> to vector<12x2xf32>
    %127 = vector.extract_strided_slice %125 {offsets = [0, 0], sizes = [12, 10], strides = [1, 1]} : vector<12x20xf32> to vector<12x10xf32>
    %cst_48 = arith.constant dense<0.000000e+00> : vector<16x10xf32>
    %128 = tpu.matmul %1, %127, %cst_48 {dimension_numbers = #tpu.dot_dimension_numbers<[1], [0], [0], [1], [0, 0, 1, 1], [], []>} : vector<16x12xf32>, vector<12x10xf32>, vector<16x10xf32> -> vector<16x10xf32>
    %129 = vector.extract_strided_slice %128 {offsets = [0, 0], sizes = [16, 8], strides = [1, 1]} : vector<16x10xf32> to vector<16x8xf32>
    %130 = vector.extract_strided_slice %128 {offsets = [0, 8], sizes = [16, 2], strides = [1, 1]} : vector<16x10xf32> to vector<16x2xf32>
    %cst_49 = arith.constant dense<0.000000e+00> : vector<16x2xf32>
    %131 = tpu.matmul %3, %126, %cst_49 {dimension_numbers = #tpu.dot_dimension_numbers<[1], [0], [0], [1], [0, 0, 1, 1], [], []>} : vector<16x12xf32>, vector<12x2xf32>, vector<16x2xf32> -> vector<16x2xf32>
    %132 = vector.extract_strided_slice %4 {offsets = [0, 4], sizes = [16, 2], strides = [1, 1]} : vector<16x6xf32> to vector<16x2xf32>
    %133 = arith.addf %130, %131 : vector<16x2xf32>
    %134 = arith.addf %133, %132 : vector<16x2xf32>
    %cst_50 = arith.constant 0.000000e+00 : f32
    %135 = vector.broadcast %cst_50 : f32 to vector<16x2xf32>
    %136 = arith.cmpf ogt, %134, %135 : vector<16x2xf32>
    %cst_51 = arith.constant 5.000000e-02 : f32
    %137 = vector.broadcast %cst_51 : f32 to vector<16x2xf32>
    %138 = arith.mulf %137, %134 : vector<16x2xf32>
    %139 = arith.select %136, %134, %138 : vector<16x2xi1>, vector<16x2xf32>
    %140 = vector.extract_strided_slice %139 {offsets = [0, 0], sizes = [16, 1], strides = [1, 1]} : vector<16x2xf32> to vector<16x1xf32>
    %cst_52 = arith.constant -1.000000e+30 : f32
    %141 = vector.shape_cast %140 : vector<16x1xf32> to vector<16x1xf32>
    %142 = vector.broadcast %141 : vector<16x1xf32> to vector<16x12xf32>
    %143 = vector.broadcast %cst_52 : f32 to vector<16x12xf32>
    %144 = arith.select %6, %142, %143 : vector<16x12xi1>, vector<16x12xf32>
    %cst_53 = arith.constant dense<0xFF800000> : vector<12xf32>
    %145 = vector.multi_reduction <maximumf>, %144, %cst_53 [0] : vector<16x12xf32> to vector<12xf32>
    %146 = vector.shape_cast %145 : vector<12xf32> to vector<1x12xf32>
    %147 = vector.extract_strided_slice %139 {offsets = [0, 1], sizes = [16, 1], strides = [1, 1]} : vector<16x2xf32> to vector<16x1xf32>
    %cst_54 = arith.constant -1.000000e+30 : f32
    %148 = vector.shape_cast %147 : vector<16x1xf32> to vector<16x1xf32>
    %149 = vector.broadcast %148 : vector<16x1xf32> to vector<16x12xf32>
    %150 = vector.broadcast %cst_54 : f32 to vector<16x12xf32>
    %151 = arith.select %6, %149, %150 : vector<16x12xi1>, vector<16x12xf32>
    %cst_55 = arith.constant dense<0xFF800000> : vector<12xf32>
    %152 = vector.multi_reduction <maximumf>, %151, %cst_55 [0] : vector<16x12xf32> to vector<12xf32>
    %153 = vector.shape_cast %152 : vector<12xf32> to vector<1x12xf32>
    %154 = tpu.concatenate %146, %153 in 0 : vector<1x12xf32>, vector<1x12xf32> -> vector<2x12xf32>
    %cst_56 = arith.constant dense<0.000000e+00> : vector<16x2xf32>
    %155 = tpu.matmul %3, %154, %cst_56 {dimension_numbers = #tpu.dot_dimension_numbers<[1], [1], [0], [0], [0, 0, 1, 0], [], []>} : vector<16x12xf32>, vector<2x12xf32>, vector<16x2xf32> -> vector<16x2xf32>
    %156 = arith.subf %139, %155 : vector<16x2xf32>
    %157 = math.exp %156 : vector<16x2xf32>
    %cst_57 = arith.constant dense<0.000000e+00> : vector<12x2xf32>
    %158 = tpu.matmul %3, %157, %cst_57 {dimension_numbers = #tpu.dot_dimension_numbers<[0], [0], [1], [1], [0, 1, 1, 1], [], []>} : vector<16x12xf32>, vector<16x2xf32>, vector<12x2xf32> -> vector<12x2xf32>
    %cst_58 = arith.constant dense<0.000000e+00> : vector<16x2xf32>
    %159 = tpu.matmul %3, %158, %cst_58 {dimension_numbers = #tpu.dot_dimension_numbers<[1], [0], [0], [1], [0, 0, 1, 1], [], []>} : vector<16x12xf32>, vector<12x2xf32>, vector<16x2xf32> -> vector<16x2xf32>
    %cst_59 = arith.constant 1.000000e-16 : f32
    %160 = vector.broadcast %cst_59 : f32 to vector<16x2xf32>
    %161 = arith.addf %159, %160 : vector<16x2xf32>
    %162 = arith.divf %157, %161 : vector<16x2xf32>
    %163 = vector.extract_strided_slice %162 {offsets = [0, 0], sizes = [16, 1], strides = [1, 1]} : vector<16x2xf32> to vector<16x1xf32>
    %164 = vector.extract_strided_slice %129 {offsets = [0, 0], sizes = [16, 4], strides = [1, 1]} : vector<16x8xf32> to vector<16x4xf32>
    %165 = vector.broadcast %163 : vector<16x1xf32> to vector<16x4xf32>
    %166 = arith.mulf %165, %164 : vector<16x4xf32>
    %167 = vector.extract_strided_slice %162 {offsets = [0, 1], sizes = [16, 1], strides = [1, 1]} : vector<16x2xf32> to vector<16x1xf32>
    %168 = vector.extract_strided_slice %129 {offsets = [0, 4], sizes = [16, 4], strides = [1, 1]} : vector<16x8xf32> to vector<16x4xf32>
    %169 = vector.broadcast %167 : vector<16x1xf32> to vector<16x4xf32>
    %170 = arith.mulf %169, %168 : vector<16x4xf32>
    %171 = tpu.concatenate %166, %170 in 1 : vector<16x4xf32>, vector<16x4xf32> -> vector<16x8xf32>
    %cst_60 = arith.constant dense<0.000000e+00> : vector<12x8xf32>
    %172 = tpu.matmul %3, %171, %cst_60 {dimension_numbers = #tpu.dot_dimension_numbers<[0], [0], [1], [1], [0, 1, 1, 1], [], []>} : vector<16x12xf32>, vector<16x8xf32>, vector<12x8xf32> -> vector<12x8xf32>
    %173 = vector.extract_strided_slice %125 {offsets = [0, 12], sizes = [12, 8], strides = [1, 1]} : vector<12x20xf32> to vector<12x8xf32>
    %174 = arith.addf %172, %173 : vector<12x8xf32>
    %cst_61 = arith.constant 0.000000e+00 : f32
    %175 = vector.broadcast %cst_61 : f32 to vector<12x8xf32>
    %176 = arith.cmpf ogt, %174, %175 : vector<12x8xf32>
    %cst_62 = arith.constant 0.000000e+00 : f32
    %177 = vector.broadcast %cst_62 : f32 to vector<12x8xf32>
    %178 = arith.minimumf %174, %177 : vector<12x8xf32>
    %179 = math.exp %178 : vector<12x8xf32>
    %cst_63 = arith.constant 1.000000e+00 : f32
    %180 = vector.broadcast %cst_63 : f32 to vector<12x8xf32>
    %181 = arith.subf %179, %180 : vector<12x8xf32>
    %182 = arith.select %176, %174, %181 : vector<12x8xi1>, vector<12x8xf32>
    %183 = vector.extract_strided_slice %182 {offsets = [0, 0], sizes = [12, 4], strides = [1, 1]} : vector<12x8xf32> to vector<12x4xf32>
    %184 = vector.extract_strided_slice %182 {offsets = [0, 4], sizes = [12, 4], strides = [1, 1]} : vector<12x8xf32> to vector<12x4xf32>
    %185 = arith.addf %183, %184 : vector<12x4xf32>
    %cst_64 = arith.constant 5.000000e-01 : f32
    %186 = vector.broadcast %cst_64 : f32 to vector<12x4xf32>
    %187 = arith.mulf %185, %186 : vector<12x4xf32>
    %188 = arith.mulf %187, %187 : vector<12x4xf32>
    %cst_65 = arith.constant dense<0.000000e+00> : vector<12xf32>
    %189 = vector.multi_reduction <add>, %188, %cst_65 [1] : vector<12x4xf32> to vector<12xf32>
    %190 = vector.shape_cast %189 : vector<12xf32> to vector<12x1xf32>
    %191 = math.sqrt %190 : vector<12x1xf32>
    %cst_66 = arith.constant 9.99999996E-13 : f32
    %192 = vector.broadcast %cst_66 : f32 to vector<12x1xf32>
    %193 = arith.maximumf %191, %192 : vector<12x1xf32>
    %194 = vector.broadcast %193 : vector<12x1xf32> to vector<12x4xf32>
    %195 = arith.divf %187, %194 : vector<12x4xf32>
    %c0_67 = arith.constant 0 : index
    %c0_68 = arith.constant 0 : index
    %196 = vector.load %arg8[%c0_67, %c0_68] : memref<12x4xf32, #tpu.memory_space<vmem>>, vector<12x4xf32>
    tpu.vector_store %arg8[%c0_67, %c0_68], %195 {strides = array<i32>} : memref<12x4xf32, #tpu.memory_space<vmem>>, vector<12x4xf32>,
    return
  }
  func.func @transform_0(%arg0: i32) -> (i32, i32) {
    %c0_i32 = arith.constant 0 : i32
    %c0_i32_0 = arith.constant 0 : i32
    %c0_i32_1 = arith.constant 0 : i32
    return %c0_i32, %c0_i32_0 : i32, i32
  }
  func.func @transform_1(%arg0: i32) -> (i32, i32) {
    %c0_i32 = arith.constant 0 : i32
    %c0_i32_0 = arith.constant 0 : i32
    %c0_i32_1 = arith.constant 0 : i32
    return %c0_i32, %c0_i32_0 : i32, i32
  }
  func.func @transform_2(%arg0: i32) -> (i32, i32) {
    %c0_i32 = arith.constant 0 : i32
    %c0_i32_0 = arith.constant 0 : i32
    %c0_i32_1 = arith.constant 0 : i32
    return %c0_i32, %c0_i32_0 : i32, i32
  }
  func.func @transform_3(%arg0: i32) -> (i32, i32) {
    %c0_i32 = arith.constant 0 : i32
    %c0_i32_0 = arith.constant 0 : i32
    %c0_i32_1 = arith.constant 0 : i32
    return %c0_i32, %c0_i32_0 : i32, i32
  }
  func.func @transform_4(%arg0: i32) -> (i32, i32) {
    %c0_i32 = arith.constant 0 : i32
    %c0_i32_0 = arith.constant 0 : i32
    %c0_i32_1 = arith.constant 0 : i32
    return %c0_i32, %c0_i32_0 : i32, i32
  }
  func.func @transform_5(%arg0: i32) -> (i32, i32) {
    %c0_i32 = arith.constant 0 : i32
    %c0_i32_0 = arith.constant 0 : i32
    %c0_i32_1 = arith.constant 0 : i32
    return %c0_i32, %c0_i32_0 : i32, i32
  }
  func.func @transform_6(%arg0: i32) -> (i32, i32) {
    %c0_i32 = arith.constant 0 : i32
    %c0_i32_0 = arith.constant 0 : i32
    %c0_i32_1 = arith.constant 0 : i32
    return %c0_i32, %c0_i32_0 : i32, i32
  }
  func.func @transform_7(%arg0: i32) -> (i32, i32) {
    %c0_i32 = arith.constant 0 : i32
    %c0_i32_0 = arith.constant 0 : i32
    %c0_i32_1 = arith.constant 0 : i32
    return %c0_i32, %c0_i32_0 : i32, i32
  }
}

</mosaic_0001>

<bundles_post_ra>
// kernel: _lambda_.1
= control target key start
LH: loop header
LB: loop body
LE: loop exit
PB: predicated region body
PF: predicated region fallthrough
CT: control target
= control target key end

     0   :  { %12 = vsyncpa [#allocation3], 0  ;;  %s3247_s0 = inlined_call_operand.hbm [shape: f32[12,16], index: 0, kind: input, shape index: {}]   ;;  %s3248_s1 = inlined_call_operand.hbm [shape: bf16[16,12], index: 1, kind: input, shape index: {}]   ;;  %s3249_s2 = inlined_call_operand.hbm [shape: bf16[16,12], index: 2, kind: input, shape index: {}]   ;;  %s3250_s3 = inlined_call_operand.hbm [shape: f32[16,6], index: 3, kind: input, shape index: {}]   ;;  %s3251_s4 = inlined_call_operand.hbm [shape: f32[16,36], index: 4, kind: input, shape index: {}]   ;;  %s3252_s5 = inlined_call_operand.hbm [shape: f32[32,68], index: 5, kind: input, shape index: {}]   ;;  %s3253_s6 = inlined_call_operand.hbm [shape: f32[32,20], index: 6, kind: input, shape index: {}]   ;;  %s3254_s7 = inlined_call_operand.vmem [shape: f32[12,4], index: 7, kind: output, shape index: {}]  }
   0x1   :  { %13 = vsyncpa [#allocation5], 0 }
   0x2   :  { %14 = vsyncpa [#allocation8], 0 }
   0x3   :  { %15 = vsyncpa [#allocation11], 0  ;;  %s2854_s24 = smov [#allocation4]  }
   0x4   :  { %s33_s25 = sshll.u32 %s2854_s24, 4  ;;  %s34_s25 = int_to_ptr.vmem [resolvable:$true] %s33_s25 }
   0x5   :  { %s2714_s26 = scalar_lea.vmem %s34_s25, 128  ;;  %p2719_p1 = scmp.lt.s32.totalorder %s34_s25, %s34_s25 }
   0x6   :  { %p2715_p0 = scmp.ne.s32.totalorder %s34_s25, %s2714_s26  ;;  %p2720_p2 = scmp.lt.s32.totalorder %s2714_s26, %s2714_s26 }
   0x8   :  { %p2721_p3 = por %p2720_p2, %p2719_p1 }
   0xa   :  { %p2722_p4 = pnand %p2721_p3, %p2715_p0 }
   0xc   :  { %2725 = shalt.err (!%p2722_p4)
}
   0xd   :  { %s2855_s27 = smov 64   ;;  %s2856_s28 = smov 4  }
   0xe   :  { %39 = dma.hbm_to_vmem [thread:$0]  %s3248_s1, 128, %s34_s25, [#allocation5], %s2855_s27, %s2855_s27, %s2856_s28  }
   0xf   :  { %s2857_s8 = smov [#allocation7]   ;;  %s2858_s10 = smov [#allocation10]  }
  0x10   :  { %s57_s9 = sshll.u32 %s2857_s8, 4  ;;  %s81_s11 = sshll.u32 %s2858_s10, 4  ;;  %s58_s9 = int_to_ptr.vmem [resolvable:$true] %s57_s9  ;;  %s82_s11 = int_to_ptr.vmem [resolvable:$true] %s81_s11 }
  0x11   :  { %s2734_s12 = scalar_lea.vmem %s58_s9, 256  ;;  %p2739_p6 = scmp.lt.s32.totalorder %s58_s9, %s58_s9 }
  0x12   :  { %p2735_p5 = scmp.ne.s32.totalorder %s58_s9, %s2734_s12  ;;  %p2740_p7 = scmp.lt.s32.totalorder %s2734_s12, %s2734_s12 }
  0x14   :  { %p2741_p8 = por %p2740_p7, %p2739_p6 }
  0x16   :  { %p2742_p9 = pnand %p2741_p8, %p2735_p5 }
  0x18   :  { %2745 = shalt.err (!%p2742_p9)
}
  0x19   :  { %s2859_s13 = smov 128   ;;  %s2860_s14 = smov 8  }
  0x1a   :  { %63 = dma.hbm_to_vmem [thread:$0]  %s3250_s3, 256, %s58_s9, [#allocation8], %s2859_s13, %s2859_s13, %s2860_s14  }
  0x1b   :  { %s2754_s1 = scalar_lea.vmem %s82_s11, 512  ;;  %p2759_p11 = scmp.lt.s32.totalorder %s82_s11, %s82_s11 }
  0x1c   :  { %p2755_p10 = scmp.ne.s32.totalorder %s82_s11, %s2754_s1  ;;  %p2760_p12 = scmp.lt.s32.totalorder %s2754_s1, %s2754_s1 }
  0x1e   :  { %p2761_p13 = por %p2760_p12, %p2759_p11 }
  0x20   :  { %p2762_p0 = pnand %p2761_p13, %p2755_p10 }
  0x22   :  { %2765 = shalt.err (!%p2762_p0)
}
  0x23   :  { %87 = dma.hbm_to_vmem [thread:$0]  %s3252_s5, 512, %s82_s11, [#allocation11], %s2859_s13, %s2859_s13, %s2860_s14  }
  0x24   :  { %s2861_s19 = smov [#allocation2]   ;;  %s2862_s21 = smov [#allocation6]  }
  0x25   :  { %s21_s20 = sshll.u32 %s2861_s19, 4  ;;  %s45_s3 = sshll.u32 %s2862_s21, 4  ;;  %s22_s20 = int_to_ptr.vmem [resolvable:$true] %s21_s20  ;;  %s46_s3 = int_to_ptr.vmem [resolvable:$true] %s45_s3 }
  0x26   :  { %s2774_s22 = scalar_lea.vmem %s22_s20, 256  ;;  %p2779_p2 = scmp.lt.s32.totalorder %s22_s20, %s22_s20 }
  0x27   :  { %p2775_p1 = scmp.ne.s32.totalorder %s22_s20, %s2774_s22  ;;  %p2780_p3 = scmp.lt.s32.totalorder %s2774_s22, %s2774_s22 }
  0x29   :  { %p2781_p4 = por %p2780_p3, %p2779_p2 }
  0x2b   :  { %p2782_p5 = pnand %p2781_p4, %p2775_p1 }
  0x2d   :  { %2785 = shalt.err (!%p2782_p5)
}
  0x2e   :  { %27 = dma.hbm_to_vmem [thread:$0]  %s3247_s0, 256, %s22_s20, [#allocation3], %s2859_s13, %s2859_s13, %s2860_s14  }
  0x2f   :  { %s2794_s5 = scalar_lea.vmem %s46_s3, 128  ;;  %p2799_p7 = scmp.lt.s32.totalorder %s46_s3, %s46_s3 }
  0x30   :  { %p2795_p6 = scmp.ne.s32.totalorder %s46_s3, %s2794_s5  ;;  %p2800_p8 = scmp.lt.s32.totalorder %s2794_s5, %s2794_s5 }
  0x32   :  { %p2801_p9 = por %p2800_p8, %p2799_p7 }
  0x34   :  { %p2802_p10 = pnand %p2801_p9, %p2795_p6 }
  0x36   :  { %2805 = shalt.err (!%p2802_p10)
}
  0x37   :  { %51 = dma.hbm_to_vmem [thread:$0]  %s3249_s2, 128, %s46_s3, [#allocation5], %s2855_s27, %s2855_s27, %s2856_s28  }
  0x38   :  { %s2863_s29 = smov [#allocation9]   ;;  %s2864_s8 = smov [#allocation12]  }
  0x39   :  { %s69_s30 = sshll.u32 %s2863_s29, 4  ;;  %s93_s0 = sshll.u32 %s2864_s8, 4  ;;  %s70_s30 = int_to_ptr.vmem [resolvable:$true] %s69_s30  ;;  %s94_s0 = int_to_ptr.vmem [resolvable:$true] %s93_s0 }
  0x3a   :  { %s2814_s9 = scalar_lea.vmem %s70_s30, 256  ;;  %p2819_p12 = scmp.lt.s32.totalorder %s70_s30, %s70_s30 }
  0x3b   :  { %p2815_p11 = scmp.ne.s32.totalorder %s70_s30, %s2814_s9  ;;  %p2820_p13 = scmp.lt.s32.totalorder %s2814_s9, %s2814_s9 }
  0x3d   :  { %p2821_p0 = por %p2820_p13, %p2819_p12 }
  0x3f   :  { %p2822_p1 = pnand %p2821_p0, %p2815_p11 }
  0x41   :  { %2825 = shalt.err (!%p2822_p1)
}
  0x42   :  { %75 = dma.hbm_to_vmem [thread:$0]  %s3251_s4, 256, %s70_s30, [#allocation8], %s2859_s13, %s2859_s13, %s2860_s14  }
  0x43   :  { %s2834_s2 = scalar_lea.vmem %s94_s0, 512  ;;  %p2839_p3 = scmp.lt.s32.totalorder %s94_s0, %s94_s0 }
  0x44   :  { %p2835_p2 = scmp.ne.s32.totalorder %s94_s0, %s2834_s2  ;;  %p2840_p4 = scmp.lt.s32.totalorder %s2834_s2, %s2834_s2 }
  0x46   :  { %p2841_p5 = por %p2840_p4, %p2839_p3 }
  0x48   :  { %p2842_p6 = pnand %p2841_p5, %p2835_p2 }
  0x4a   :  { %2845 = shalt.err (!%p2842_p6)
}
  0x4b   :  { %99 = dma.hbm_to_vmem [thread:$0]  %s3253_s6, 512, %s94_s0, [#allocation11], %s2859_s13, %s2859_s13, %s2860_s14  }
  0x4c   :  { %2846 = dma.done.wait [#allocation3], 256  }
  0x4d   :  { %2847 = vsyncadd [#allocation3], 4294967040 }
  0x4e   :  { %2848 = dma.done.wait [#allocation5], 256  }
  0x4f   :  { %2849 = vsyncadd [#allocation5], 4294967040 }
  0x50   :  { %2850 = dma.done.wait [#allocation8], 512  }
  0x51   :  { %2851 = vsyncadd [#allocation8], 4294966784 }
  0x52   :  { %2852 = dma.done.wait [#allocation11], 1024  }
  0x53   :  { %2853 = vsyncadd [#allocation11], 4294966272  ;;  %vm137_vm0 = vcmask 130048   ;;  %v136_v0 = vld [vmem:[#allocation9 + $0x8] sm:$0xff]  ;;  %v135_v1 = vld [vmem:[#allocation9] sm:$0xff]  ;;  %vm219_vm1 = vcmask 97280  }
  0x54   :  { %v133_v2 = vld [vmem:[#allocation2] sm:$0xff]  ;;  %2468 = vmatprep.subr.mxu0 %v136_v0  ;;  %v134_v3 = vld [vmem:[#allocation2 + $0x8] sm:$0xf]  ;;  %v2380_v4 = vld [vmem:[#allocation6] sm:$0xff]   ;;  %vm226_vm2 = vcmask 1043456   ;;  %s2865_s4 = smov 94  }
  0x55   :  { %2472 = vmatprep.mubr.msk.f32.mxu0 %vm137_vm0, %v133_v2  ;;  %2469 = vmatpush3.msra.mxu0 %v136_v0  ;;  %v2962_v5 = vunpack.c.l.bf16 %v2380_v4  ;;  %v2376_v6 = vld [vmem:[#allocation4] sm:$0xff]   ;;  %v2982_v12 = vunpack.c.h.bf16 %v2380_v4  ;;  %v2986_v14 = vld [vmem:[#allocation7] sm:$0xff]  ;;  %s2866_s6 = smov 32   ;;  %v2867_v15 = vmov 32   ;;  %v2994_v18 = vld [vmem:[#allocation7 + $0x8] sm:$0xff]  ;;  %v2868_v33 = vmov 33  }
  0x56   :  { %2470 = vmatprep.subr.mxu0 %v135_v1  ;;  %v2966_v7 = vunpack.c.l.bf16 %v2376_v6  ;;  %v2972_v9 = vunpack.c.h.bf16 %v2376_v6  ;;  %2643 = vset.pattern.permute.xlu0 %v2867_v15  ;;  %vm460_vm7 = vcmask 1040384   ;;  %s2869_s13 = smov 96   ;;  %vm880_vm8 = vcmask 261120   ;;  %s2870_s15 = smov 30  }
  0x57   :  { %2471 = vmatpush3.msra.mxu0 %v135_v1  ;;  %2642 = vset.pattern.permute.xlu1 %v2867_v15  ;;  %vm131_vm5 = vcmp.gt.f32.partialorder %v2962_v5, 0.0  ;;  %vm132_vm6 = vcmp.gt.f32.partialorder %v2982_v12, 0.0  ;;  %s2871_s16 = smov 92   ;;  %s2872_s1 = smov 118  }
  0x58   :  { %2473 = vmatmul.mubr.msk.f32.vlgmr.msra.gmra.mxu0 %vm137_vm0, %v134_v3  ;;  %2479 = vmatprep.mubr.msk.f32.mxu1 %vm219_vm1, %v2966_v7  ;;  %s2876_s17 = smov 116  }
  0x59   :  { %2486 = vmatprep.mubr.msk.f32.mxu0 %vm219_vm1, %v2962_v5 }
 0x118   :  { %v2474_v8 = vpop.f32.mrf.mxu0 }
 0x119   :  { %308 = vrot.lane.b32.xlu0 %v2474_v8, %s2865_s4  ;;  %2475 = vmatprep.subr.msk.mxu1 %vm226_vm2, %v2474_v8 }
 0x11a   :  { %v210_v10 = vpop.f32.mrf.mxu0  ;;  %2476 = vmatpush3.msk.msra.mxu1 %vm226_vm2, %v2474_v8 }
 0x11b   :  { %2477 = vmatprep.subr.mxu1 %v210_v10 }
 0x11c   :  { %2478 = vmatpush3.msra.mxu1 %v210_v10 }
 0x11d   :  { %306 = vrot.lane.b32.xlu0 %v210_v10, %s2865_s4  ;;  %2480 = vmatmul.mubr.msk.f32.vlgmr.msra.gmra.mxu1 %vm219_vm1, %v2972_v9 }
 0x11e   :  { %2491 = vmatprep.mubr.msk.f32.mxu1 %vm219_vm1, %v2962_v5 }
 0x121   :  { %406 = vrot.lane.b32.xlu0 %v2986_v14, %s2866_s6 }
 0x18b   :  { %v309_v11 = vpop.permute.xlu0 %308 }
 0x18c   :  { %2482 = vmatprep.subr.msk.mxu0 %vm226_vm2, %v309_v11 }
 0x18d   :  { %2483 = vmatpush3.msk.msra.mxu0 %vm226_vm2, %v309_v11 }
 0x18f   :  { %v307_v13 = vpop.permute.xlu0 %306 }
 0x190   :  { %2484 = vmatprep.subr.mxu0 %v307_v13 }
 0x191   :  { %2485 = vmatpush3.msra.mxu0 %v307_v13 }
 0x192   :  { %2487 = vmatmul.mubr.msk.f32.vlgmr.msra.gmra.mxu0 %vm219_vm1, %v2982_v12 }
 0x193   :  { %v407_v23 = vpop.permute.xlu0 %406 }
 0x1dd   :  { %v2998_v20 = vpop.f32.mrf.mxu1 }
 0x1df   :  { %v3000_v21 = vpop.f32.mrf.mxu1 }
 0x252   :  { %v2488_v16 = vpop.f32.mrf.mxu0 }
 0x253   :  { %398 = vrot.lane.b32.xlu1 %v2488_v16, %s2866_s6 }
 0x254   :  { %v385_v17 = vpop.f32.mrf.mxu0 }
 0x257   :  { %396 = vrot.lane.b32.xlu1 %v385_v17, %s2866_s6 }
 0x25b   :  { %408 = vrot.lane.b32.xlu1 %v2994_v18, %s2866_s6 }
 0x2c5   :  { %v399_v19 = vpop.permute.xlu1 %398 }
 0x2c6   :  { %v403_v26 = vadd.f32 %v2998_v20, %v399_v19 }
 0x2c9   :  { %v397_v22 = vpop.permute.xlu1 %396 }
 0x2ca   :  { %v402_v24 = vadd.f32 %v397_v22, %v3000_v21 }
 0x2cc   :  { %v412_v25 = vadd.f32 %v407_v23, %v402_v24 }
 0x2cd   :  { %v409_v27 = vpop.permute.xlu1 %408 }
 0x2ce   :  { %v416_v28 = vmul.f32 0.05, %v412_v25  ;;  %v413_v29 = vadd.f32 %v409_v27, %v403_v26  ;;  %vm414_vm3 = vcmp.gt.f32.partialorder %v412_v25, 0.0 }
 0x2d0   :  { %v417_v30 = vmul.f32 0.05, %v413_v29  ;;  %v418_v31 = vsel %vm414_vm3, %v412_v25, %v416_v28  ;;  %vm415_vm4 = vcmp.gt.f32.partialorder %v413_v29, 0.0 }
 0x2d1   :  { %422 = vperm.xlu0 %2643, %v418_v31  }
 0x2d2   :  { %v419_v32 = vsel %vm415_vm4, %v413_v29, %v417_v30  ;;  %vm2281_vm4 = vcmask 27648  }
 0x2d3   :  { %427 = vperm.xlu1 %2642, %v419_v32  }
 0x2d5   :  { %2645 = vset.pattern.permute.xlu0 %v2868_v33 }
 0x2d6   :  { %446 = vperm.xlu0 %2645, %v419_v32  }
 0x2d7   :  { %2644 = vset.pattern.permute.xlu1 %v2868_v33 }
 0x2d8   :  { %442 = vperm.xlu1 %2644, %v418_v31  }
 0x2dc   :  { %2646 = vset.pattern.permute.xlu1 %v2867_v15 }
 0x34c   :  { %v423_v34 = vpop.permute.xlu0 %422 }
 0x34d   :  { %v430_v35 = vsel %vm131_vm5, %v423_v34, -1e+30 }
 0x34e   :  { %v428_v36 = vpop.permute.xlu1 %427  ;;  %v432_v38 = vsel %vm219_vm1, %v430_v35, -inf }
 0x34f   :  { %v431_v37 = vsel %vm132_vm6, %v428_v36, -1e+30 }
 0x350   :  { %v433_v39 = vsel %vm219_vm1, %v431_v37, -inf }
 0x351   :  { %v434_v40 = vmax.f32 %v432_v38, %v433_v39  ;;  %v447_v41 = vpop.permute.xlu0 %446 }
 0x352   :  { %v450_v42 = vsel %vm132_vm6, %v447_v41, -1e+30 }
 0x353   :  { %v435_v43 = vrot.slane %v434_v40, 4  ;;  %v443_v44 = vpop.permute.xlu1 %442  ;;  %v452_v47 = vsel %vm219_vm1, %v450_v42, -inf }
 0x354   :  { %v449_v45 = vsel %vm131_vm5, %v443_v44, -1e+30  ;;  %v877_v44 = vld [vmem:[#allocation10 + $0x8] sm:$0xff] }
 0x355   :  { %v436_v46 = vmax.f32 %v434_v40, %v435_v43  ;;  %v451_v48 = vsel %vm219_vm1, %v449_v45, -inf  ;;  %v878_v43 = vld [vmem:[#allocation10 + $0x10] sm:$0xff]  ;;  %v876_v45 = vld [vmem:[#allocation10] sm:$0xff] }
 0x356   :  { %v453_v49 = vmax.f32 %v451_v48, %v452_v47 }
 0x357   :  { %v437_v50 = vrot.slane %v436_v46, 2 }
 0x358   :  { %v454_v51 = vrot.slane %v453_v49, 4 }
 0x359   :  { %v438_v52 = vmax.f32 %v436_v46, %v437_v50 }
 0x35a   :  { %v455_v53 = vmax.f32 %v453_v49, %v454_v51 }
 0x35b   :  { %v439_v55 = vrot.slane %v438_v52, 1 }
 0x35c   :  { %v456_v54 = vrot.slane %v455_v53, 2 }
 0x35d   :  { %v440_v58 = vmax.f32 %v438_v52, %v439_v55 }
 0x35e   :  { %v457_v56 = vmax.f32 %v455_v53, %v456_v54 }
 0x360   :  { %v458_v57 = vrot.slane %v457_v56, 1 }
 0x362   :  { %v459_v59 = vmax.f32 %v457_v56, %v458_v57 }
 0x364   :  { %v461_v60 = vsel %vm460_vm7, %v440_v58, %v459_v59 }
 0x365   :  { %2489 = vmatprep.subr.msk.mxu1 %vm219_vm1, %v461_v60 }
 0x366   :  { %2490 = vmatpush3.xpose.msk.msra.mxu1 %vm219_vm1, %v461_v60 }
 0x369   :  { %2492 = vmatmul.mubr.msk.f32.vlgmr.msra.gmra.mxu1 %vm219_vm1, %v2982_v12 }
 0x36a   :  { %2505 = vmatprep.mubr.msk.f32.mxu1 %vm219_vm1, %v2962_v5 }
 0x429   :  { %v2493_v61 = vpop.f32.mrf.mxu1 }
 0x42a   :  { %544 = vrot.lane.b32.xlu1 %v2493_v61, %s2866_s6 }
 0x42b   :  { %v531_v62 = vpop.f32.mrf.mxu1 }
 0x42e   :  { %542 = vrot.lane.b32.xlu1 %v531_v62, %s2866_s6 }
 0x49c   :  { %v545_v63 = vpop.permute.xlu1 %544 }
 0x49d   :  { %v549_v0 = vsub.f32 %v419_v32, %v545_v63 }
 0x49f   :  { %v552_v1 = vmul.f32 1.442695, %v549_v0 }
 0x4a0   :  { %v543_v2 = vpop.permute.xlu1 %542 }
 0x4a1   :  { %2662 = vpow2.f32 %v552_v1  ;;  %v548_v3 = vsub.f32 %v418_v31, %v543_v2 }
 0x4a3   :  { %v550_v4 = vmul.f32 1.442695, %v548_v3 }
 0x4a5   :  { %2664 = vpow2.f32 %v550_v4 }
 0x4ae   :  { %v2663_v6 = vpop.eup %2662 }
 0x4af   :  { %590 = vrot.lane.b32.xlu0 %v2663_v6, %s2869_s13 }
 0x4b2   :  { %v2665_v8 = vpop.eup %2664 }
 0x4b3   :  { %588 = vrot.lane.b32.xlu1 %v2665_v8, %s2869_s13 }
 0x4cd   :  { %554 = vxpose.xlu0.b32.start [1/2] (short) (narrow) %v2962_v5, 16 }
 0x4d1   :  { %555 = vxpose.xlu0.b32.end [2/2] (short) (narrow) %v2982_v12, 16 }
 0x4fa   :  { %2652 = vset.pattern.permute.xlu0 %v2867_v15 }
 0x521   :  { %v591_v10 = vpop.permute.xlu0 %590 }
 0x522   :  { %2494 = vmatprep.subr.mxu0 %v591_v10 }
 0x523   :  { %2495 = vmatpush3.msra.mxu0 %v591_v10 }
 0x525   :  { %v589_v11 = vpop.permute.xlu1 %588 }
 0x526   :  { %2496 = vmatprep.subr.mxu0 %v589_v11 }
 0x527   :  { %2497 = vmatpush3.msra.mxu0 %v589_v11 }
 0x549   :  { %v3035_v13 = vpop.trf.xlu0 }
 0x54a   :  { %2498 = vmatprep.mubr.msk.f32.mxu0 %vm137_vm0, %v3035_v13 }
 0x54d   :  { %v3039_v16 = vpop.trf.xlu0 }
 0x54e   :  { %2499 = vmatmul.mubr.msk.f32.vlgmr.msra.gmra.mxu0 %vm137_vm0, %v3039_v16 }
 0x54f   :  { %2512 = vmatprep.mubr.msk.f32.mxu0 %vm137_vm0, %v3035_v13 }
 0x60e   :  { %v2500_v17 = vpop.f32.mrf.mxu0 }
 0x60f   :  { %2501 = vmatprep.subr.msk.mxu1 %vm226_vm2, %v2500_v17 }
 0x610   :  { %v666_v19 = vpop.f32.mrf.mxu0  ;;  %2502 = vmatpush3.msk.msra.mxu1 %vm226_vm2, %v2500_v17 }
 0x611   :  { %2503 = vmatprep.subr.mxu1 %v666_v19 }
 0x612   :  { %2504 = vmatpush3.msra.mxu1 %v666_v19 }
 0x613   :  { %2506 = vmatmul.mubr.msk.f32.vlgmr.msra.gmra.mxu1 %vm219_vm1, %v2982_v12 }
 0x6d3   :  { %v2507_v22 = vpop.f32.mrf.mxu1 }
 0x6d4   :  { %v750_v23 = vadd.f32 1e-16, %v2507_v22 }
 0x6d5   :  { %v744_v24 = vpop.f32.mrf.mxu1 }
 0x6d6   :  { %757 = vrot.lane.b32.xlu1 %v750_v23, %s2866_s6  ;;  %v745_v25 = vadd.f32 1e-16, %v744_v24 }
 0x6da   :  { %755 = vrot.lane.b32.xlu1 %v745_v25, %s2866_s6 }
 0x748   :  { %v758_v26 = vpop.permute.xlu1 %757 }
 0x749   :  { %2666 = vrcp.f32 %v758_v26 }
 0x74c   :  { %v756_v27 = vpop.permute.xlu1 %755 }
 0x74d   :  { %2668 = vrcp.f32 %v756_v27 }
 0x756   :  { %v2667_v28 = vpop.eup %2666 }
 0x757   :  { %v764_v29 = vmul.f32 %v2667_v28, %v2663_v6 }
 0x759   :  { %772 = vperm.xlu1 %2646, %v764_v29  }
 0x75a   :  { %v2669_v30 = vpop.eup %2668 }
 0x75b   :  { %v762_v31 = vmul.f32 %v2669_v30, %v2665_v8 }
 0x75d   :  { %2647 = vset.pattern.permute.xlu1 %v2868_v33 }
 0x75e   :  { %782 = vperm.xlu1 %2647, %v764_v29  }
 0x762   :  { %2648 = vset.pattern.permute.xlu1 %v2867_v15 }
 0x763   :  { %767 = vperm.xlu1 %2648, %v762_v31  }
 0x767   :  { %2649 = vset.pattern.permute.xlu1 %v2868_v33 }
 0x768   :  { %778 = vperm.xlu1 %2649, %v762_v31  }
 0x76c   :  { %2650 = vset.pattern.permute.xlu1 %v2867_v15 }
 0x7d4   :  { %v773_v32 = vpop.permute.xlu1 %772 }
 0x7d5   :  { %v776_v35 = vmul.f32 %v2998_v20, %v773_v32 }
 0x7d9   :  { %v783_v34 = vpop.permute.xlu1 %782 }
 0x7da   :  { %v786_v36 = vmul.f32 %v2998_v20, %v783_v34  ;;  %v879_v20 = vld [vmem:[#allocation10 + $0x18] sm:$0xff] }
 0x7db   :  { %2515 = vmatprep.subr.mxu1 %v879_v20 }
 0x7dc   :  { %v788_v37 = vsel %vm137_vm0, %v776_v35, %v786_v36  ;;  %2516 = vmatpush3.msra.mxu1 %v879_v20 }
 0x7dd   :  { %2508 = vmatprep.subr.mxu0 %v788_v37  ;;  %2517 = vmatprep.subr.mxu1 %v878_v43 }
 0x7de   :  { %2509 = vmatpush3.msra.mxu0 %v788_v37  ;;  %v768_v38 = vpop.permute.xlu1 %767  ;;  %2518 = vmatpush3.msra.mxu1 %v878_v43 }
 0x7df   :  { %v775_v40 = vmul.f32 %v768_v38, %v3000_v21  ;;  %2519 = vmatprep.subr.mxu1 %v877_v44 }
 0x7e0   :  { %2520 = vmatpush3.msra.mxu1 %v877_v44 }
 0x7e1   :  { %2521 = vmatprep.subr.mxu1 %v876_v45 }
 0x7e2   :  { %2522 = vmatpush3.msra.mxu1 %v876_v45 }
 0x7e3   :  { %v779_v39 = vpop.permute.xlu1 %778 }
 0x7e4   :  { %v785_v41 = vmul.f32 %v779_v39, %v3000_v21 }
 0x7e6   :  { %v787_v42 = vsel %vm137_vm0, %v775_v40, %v785_v41 }
 0x7e7   :  { %2510 = vmatprep.subr.mxu0 %v787_v42 }
 0x7e8   :  { %2511 = vmatpush3.msra.mxu0 %v787_v42 }
 0x7e9   :  { %2513 = vmatmul.mubr.msk.f32.vlgmr.msra.gmra.mxu0 %vm137_vm0, %v3039_v16 }
 0x7ea   :  { %2530 = vmatprep.mubr.msk.f32.mxu0 %vm219_vm1, %v2966_v7 }
 0x8a9   :  { %v2514_v21 = vpop.f32.mrf.mxu0 }
 0x8aa   :  { %v867_v46 = vmin.f32 %v2514_v21, 0.0  ;;  %vm865_vm10 = vcmp.gt.f32.partialorder %v2514_v21, 0.0 }
 0x8ab   :  { %v855_v47 = vpop.f32.mrf.mxu0 }
 0x8ac   :  { %v870_v48 = vmul.f32 1.442695, %v867_v46  ;;  %v866_v49 = vmin.f32 %v855_v47, 0.0  ;;  %vm864_vm9 = vcmp.gt.f32.partialorder %v855_v47, 0.0 }
 0x8ae   :  { %2670 = vpow2.f32 %v870_v48  ;;  %v868_v50 = vmul.f32 1.442695, %v866_v49 }
 0x8b0   :  { %2672 = vpow2.f32 %v868_v50 }
 0x8bb   :  { %v2671_v51 = vpop.eup %2670 }
 0x8bc   :  { %v2334_v53 = vadd.f32 -1.0, %v2671_v51 }
 0x8bd   :  { %v2673_v52 = vpop.eup %2672 }
 0x8be   :  { %v2333_v54 = vadd.f32 -1.0, %v2673_v52  ;;  %v875_v56 = vsel %vm865_vm10, %v2514_v21, %v2334_v53 }
 0x8c0   :  { %v874_v55 = vsel %vm864_vm9, %v855_v47, %v2333_v54 }
 0x8c1   :  { %2523 = vmatprep.mubr.msk.f32.mxu1 %vm880_vm8, %v874_v55 }
 0x8c2   :  { %2524 = vmatmul.mubr.msk.f32.vlgmr.msra.gmra.mxu1 %vm880_vm8, %v875_v56 }
 0x8c3   :  { %2542 = vmatprep.mubr.msk.f32.mxu1 %vm219_vm1, %v2962_v5 }
 0x982   :  { %v3069_v57 = vpop.f32.mrf.mxu1 }
 0x983   :  { %1043 = vrot.lane.b32.xlu1 %v3069_v57, %s2865_s4  ;;  %2526 = vmatprep.subr.msk.mxu0 %vm226_vm2, %v3069_v57 }
 0x984   :  { %v3075_v58 = vpop.f32.mrf.mxu1  ;;  %2527 = vmatpush3.msk.msra.mxu0 %vm226_vm2, %v3069_v57 }
 0x985   :  { %2528 = vmatprep.subr.mxu0 %v3075_v58 }
 0x986   :  { %2529 = vmatpush3.msra.mxu0 %v3075_v58 }
 0x987   :  { %1041 = vrot.lane.b32.xlu1 %v3075_v58, %s2865_s4  ;;  %2531 = vmatmul.mubr.msk.f32.vlgmr.msra.gmra.mxu0 %vm219_vm1, %v2972_v9 }
 0x988   :  { %2537 = vmatprep.mubr.msk.f32.mxu0 %vm219_vm1, %v2962_v5 }
 0x98b   :  { %1133 = vrot.lane.b32.xlu1 %v2986_v14, %s2870_s15 }
 0x9f5   :  { %v1044_v59 = vpop.permute.xlu1 %1043 }
 0x9f6   :  { %2533 = vmatprep.subr.msk.mxu0 %vm226_vm2, %v1044_v59 }
 0x9f7   :  { %2534 = vmatpush3.msk.msra.mxu0 %vm226_vm2, %v1044_v59 }
 0x9f9   :  { %v1042_v60 = vpop.permute.xlu1 %1041 }
 0x9fa   :  { %2535 = vmatprep.subr.mxu0 %v1042_v60 }
 0x9fb   :  { %2536 = vmatpush3.msra.mxu0 %v1042_v60 }
 0x9fc   :  { %2538 = vmatmul.mubr.msk.f32.vlgmr.msra.gmra.mxu0 %vm219_vm1, %v2982_v12 }
 0x9fd   :  { %2549 = vmatprep.mubr.msk.f32.mxu0 %vm137_vm0, %v3035_v13  ;;  %v1134_v1 = vpop.permute.xlu1 %1133 }
 0xa47   :  { %v3094_v61 = vpop.f32.mrf.mxu0 }
 0xa49   :  { %v3096_v62 = vpop.f32.mrf.mxu0 }
 0xabc   :  { %v2539_v63 = vpop.f32.mrf.mxu0 }
 0xabd   :  { %1127 = vrot.lane.b32.xlu0 %v2539_v63, %s2866_s6 }
 0xabe   :  { %v1114_v0 = vpop.f32.mrf.mxu0 }
 0xabf   :  { %1125 = vrot.lane.b32.xlu1 %v1114_v0, %s2866_s6 }
 0xac3   :  { %1135 = vrot.lane.b32.xlu1 %v2994_v18, %s2870_s15 }
 0xb2f   :  { %v1128_v2 = vpop.permute.xlu0 %1127 }
 0xb30   :  { %v1132_v6 = vadd.f32 %v3094_v61, %v1128_v2 }
 0xb31   :  { %v1126_v3 = vpop.permute.xlu1 %1125 }
 0xb32   :  { %v1131_v4 = vadd.f32 %v1126_v3, %v3096_v62 }
 0xb34   :  { %v1139_v10 = vadd.f32 %v1134_v1, %v1131_v4 }
 0xb35   :  { %v1136_v8 = vpop.permute.xlu1 %1135 }
 0xb36   :  { %v1140_v11 = vadd.f32 %v1136_v8, %v1132_v6  ;;  %v1143_v22 = vmul.f32 0.05, %v1139_v10  ;;  %vm1141_vm12 = vcmp.gt.f32.partialorder %v1139_v10, 0.0 }
 0xb38   :  { %v1144_v17 = vmul.f32 0.05, %v1140_v11  ;;  %vm1142_vm11 = vcmp.gt.f32.partialorder %v1140_v11, 0.0  ;;  %v1145_v23 = vsel %vm1141_vm12, %v1139_v10, %v1143_v22 }
 0xb3a   :  { %v1146_v19 = vsel %vm1142_vm11, %v1140_v11, %v1144_v17 }
 0xb3b   :  { %1154 = vperm.xlu1 %2650, %v1146_v19  }
 0xb3f   :  { %1149 = vperm.xlu1 %2650, %v1145_v23  }
 0xb43   :  { %2651 = vset.pattern.permute.xlu1 %v2868_v33 }
 0xb44   :  { %1169 = vperm.xlu1 %2651, %v1145_v23  }
 0xb48   :  { %1173 = vperm.xlu1 %2651, %v1146_v19  }
 0xbb6   :  { %v1155_v24 = vpop.permute.xlu1 %1154 }
 0xbb7   :  { %v1158_v25 = vsel %vm132_vm6, %v1155_v24, -1e+30 }
 0xbb8   :  { %v1160_v28 = vsel %vm219_vm1, %v1158_v25, -inf }
 0xbba   :  { %v1150_v26 = vpop.permute.xlu1 %1149 }
 0xbbb   :  { %v1157_v27 = vsel %vm131_vm5, %v1150_v26, -1e+30 }
 0xbbc   :  { %v1159_v29 = vsel %vm219_vm1, %v1157_v27, -inf }
 0xbbd   :  { %v1161_v30 = vmax.f32 %v1159_v29, %v1160_v28 }
 0xbbf   :  { %v1162_v31 = vrot.slane %v1161_v30, 4  ;;  %v1170_v32 = vpop.permute.xlu1 %1169 }
 0xbc0   :  { %v1176_v35 = vsel %vm131_vm5, %v1170_v32, -1e+30  ;;  %v1571_v32 = vld [vmem:[#allocation12 + $0x8] sm:$0xff] }
 0xbc1   :  { %v1163_v34 = vmax.f32 %v1161_v30, %v1162_v31  ;;  %v1178_v38 = vsel %vm219_vm1, %v1176_v35, -inf }
 0xbc3   :  { %v1174_v36 = vpop.permute.xlu1 %1173  ;;  %v1164_v40 = vrot.slane %v1163_v34, 2 }
 0xbc4   :  { %v1177_v37 = vsel %vm132_vm6, %v1174_v36, -1e+30 }
 0xbc5   :  { %v1179_v39 = vsel %vm219_vm1, %v1177_v37, -inf  ;;  %v1165_v20 = vmax.f32 %v1163_v34, %v1164_v40  ;;  %v1570_v34 = vld [vmem:[#allocation12] sm:$0xff] }
 0xbc6   :  { %v1180_v41 = vmax.f32 %v1178_v38, %v1179_v39 }
 0xbc7   :  { %v1166_v45 = vrot.slane %v1165_v20, 1 }
 0xbc8   :  { %v1181_v42 = vrot.slane %v1180_v41, 4 }
 0xbc9   :  { %v1167_v47 = vmax.f32 %v1165_v20, %v1166_v45 }
 0xbca   :  { %v1182_v43 = vmax.f32 %v1180_v41, %v1181_v42 }
 0xbcc   :  { %v1183_v44 = vrot.slane %v1182_v43, 2 }
 0xbce   :  { %v1184_v21 = vmax.f32 %v1182_v43, %v1183_v44 }
 0xbd0   :  { %v1185_v46 = vrot.slane %v1184_v21, 1 }
 0xbd2   :  { %v1186_v48 = vmax.f32 %v1184_v21, %v1185_v46 }
 0xbd4   :  { %v1187_v49 = vsel %vm460_vm7, %v1167_v47, %v1186_v48 }
 0xbd5   :  { %2540 = vmatprep.subr.msk.mxu1 %vm219_vm1, %v1187_v49 }
 0xbd6   :  { %2541 = vmatpush3.xpose.msk.msra.mxu1 %vm219_vm1, %v1187_v49 }
 0xbd9   :  { %2543 = vmatmul.mubr.msk.f32.vlgmr.msra.gmra.mxu1 %vm219_vm1, %v2982_v12 }
 0xbda   :  { %2556 = vmatprep.mubr.msk.f32.mxu1 %vm219_vm1, %v2962_v5 }
 0xc99   :  { %v2544_v50 = vpop.f32.mrf.mxu1 }
 0xc9a   :  { %1270 = vrot.lane.b32.xlu1 %v2544_v50, %s2866_s6 }
 0xc9b   :  { %v1257_v51 = vpop.f32.mrf.mxu1 }
 0xc9e   :  { %1268 = vrot.lane.b32.xlu1 %v1257_v51, %s2866_s6 }
 0xd0c   :  { %v1271_v52 = vpop.permute.xlu1 %1270 }
 0xd0d   :  { %v1275_v53 = vsub.f32 %v1146_v19, %v1271_v52 }
 0xd0f   :  { %v1278_v54 = vmul.f32 1.442695, %v1275_v53 }
 0xd10   :  { %v1269_v55 = vpop.permute.xlu1 %1268 }
 0xd11   :  { %2674 = vpow2.f32 %v1278_v54  ;;  %v1274_v56 = vsub.f32 %v1145_v23, %v1269_v55 }
 0xd13   :  { %v1276_v59 = vmul.f32 1.442695, %v1274_v56 }
 0xd15   :  { %2676 = vpow2.f32 %v1276_v59 }
 0xd1e   :  { %v2675_v60 = vpop.eup %2674 }
 0xd1f   :  { %1284 = vrot.lane.b32.xlu1 %v2675_v60, %s2869_s13 }
 0xd22   :  { %v2677_v63 = vpop.eup %2676 }
 0xd23   :  { %1282 = vrot.lane.b32.xlu1 %v2677_v63, %s2869_s13 }
 0xd91   :  { %v1285_v0 = vpop.permute.xlu1 %1284 }
 0xd92   :  { %2545 = vmatprep.subr.mxu0 %v1285_v0 }
 0xd93   :  { %2546 = vmatpush3.msra.mxu0 %v1285_v0 }
 0xd95   :  { %v1283_v1 = vpop.permute.xlu1 %1282 }
 0xd96   :  { %2547 = vmatprep.subr.mxu0 %v1283_v1 }
 0xd97   :  { %2548 = vmatpush3.msra.mxu0 %v1283_v1 }
 0xd98   :  { %2550 = vmatmul.mubr.msk.f32.vlgmr.msra.gmra.mxu0 %vm137_vm0, %v3039_v16 }
 0xd99   :  { %2563 = vmatprep.mubr.msk.f32.mxu0 %vm137_vm0, %v3035_v13 }
 0xe58   :  { %v2551_v2 = vpop.f32.mrf.mxu0 }
 0xe59   :  { %2552 = vmatprep.subr.msk.mxu1 %vm226_vm2, %v2551_v2 }
 0xe5a   :  { %v1354_v3 = vpop.f32.mrf.mxu0  ;;  %2553 = vmatpush3.msk.msra.mxu1 %vm226_vm2, %v2551_v2 }
 0xe5b   :  { %2554 = vmatprep.subr.mxu1 %v1354_v3 }
 0xe5c   :  { %2555 = vmatpush3.msra.mxu1 %v1354_v3 }
 0xe5d   :  { %2557 = vmatmul.mubr.msk.f32.vlgmr.msra.gmra.mxu1 %vm219_vm1, %v2982_v12 }
 0xf1d   :  { %v2558_v4 = vpop.f32.mrf.mxu1 }
 0xf1e   :  { %v1438_v6 = vadd.f32 1e-16, %v2558_v4 }
 0xf1f   :  { %v1432_v8 = vpop.f32.mrf.mxu1 }
 0xf20   :  { %v1433_v10 = vadd.f32 1e-16, %v1432_v8  ;;  %1445 = vrot.lane.b32.xlu0 %v1438_v6, %s2866_s6  ;;  %v2874_v8 = vmov 9  }
 0xf22   :  { %1443 = vrot.lane.b32.xlu1 %v1433_v10, %s2866_s6 }
 0xf92   :  { %v1446_v11 = vpop.permute.xlu0 %1445 }
 0xf93   :  { %2678 = vrcp.f32 %v1446_v11 }
 0xf94   :  { %v1444_v17 = vpop.permute.xlu1 %1443 }
 0xf95   :  { %2680 = vrcp.f32 %v1444_v17 }
 0xfa0   :  { %v2679_v19 = vpop.eup %2678 }
 0xfa1   :  { %v1452_v22 = vmul.f32 %v2679_v19, %v2675_v60 }
 0xfa2   :  { %v2681_v23 = vpop.eup %2680 }
 0xfa3   :  { %1460 = vperm.xlu0 %2652, %v1452_v22   ;;  %1470 = vperm.xlu1 %2651, %v1452_v22   ;;  %v1450_v24 = vmul.f32 %v2681_v23, %v2677_v63 }
 0xfa7   :  { %2654 = vset.pattern.permute.xlu0 %v2868_v33  ;;  %2653 = vset.pattern.permute.xlu1 %v2867_v15 }
 0xfa8   :  { %1466 = vperm.xlu0 %2654, %v1450_v24   ;;  %1455 = vperm.xlu1 %2653, %v1450_v24  }
 0xfac   :  { %1477 = vrot.lane.b32.xlu1 %v3075_v58, %s2871_s16 }
 0xfb0   :  { %1479 = vrot.lane.b32.xlu1 %v3069_v57, %s2871_s16  ;;  %v1573_v57 = vld [vmem:[#allocation12 + $0x18] sm:$0xff] }
 0xfb1   :  { %2566 = vmatprep.subr.mxu1 %v1573_v57 }
 0xfb2   :  { %2567 = vmatpush3.msra.mxu1 %v1573_v57 }
0x101e   :  { %v1461_v25 = vpop.permute.xlu0 %1460  ;;  %v1471_v26 = vpop.permute.xlu1 %1470 }
0x101f   :  { %v1464_v27 = vmul.f32 %v3094_v61, %v1461_v25  ;;  %v1474_v28 = vmul.f32 %v3094_v61, %v1471_v26  ;;  %v1572_v61 = vld [vmem:[#allocation12 + $0x10] sm:$0xff] }
0x1020   :  { %2568 = vmatprep.subr.mxu1 %v1572_v61 }
0x1021   :  { %v1476_v29 = vsel %vm137_vm0, %v1464_v27, %v1474_v28  ;;  %2569 = vmatpush3.msra.mxu1 %v1572_v61 }
0x1022   :  { %2559 = vmatprep.subr.mxu0 %v1476_v29  ;;  %2570 = vmatprep.subr.mxu1 %v1571_v32 }
0x1023   :  { %v1467_v30 = vpop.permute.xlu0 %1466  ;;  %2560 = vmatpush3.msra.mxu0 %v1476_v29  ;;  %v1456_v33 = vpop.permute.xlu1 %1455  ;;  %2571 = vmatpush3.msra.mxu1 %v1571_v32 }
0x1024   :  { %v1473_v15 = vmul.f32 %v1467_v30, %v3096_v62  ;;  %v1463_v31 = vmul.f32 %v1456_v33, %v3096_v62  ;;  %2572 = vmatprep.subr.mxu1 %v1570_v34 }
0x1025   :  { %2573 = vmatpush3.msra.mxu1 %v1570_v34 }
0x1026   :  { %v1475_v58 = vsel %vm137_vm0, %v1463_v31, %v1473_v15 }
0x1027   :  { %2561 = vmatprep.subr.mxu0 %v1475_v58  ;;  %v1478_v62 = vpop.permute.xlu1 %1477 }
0x1028   :  { %2562 = vmatpush3.msra.mxu0 %v1475_v58 }
0x1029   :  { %2564 = vmatmul.mubr.msk.f32.vlgmr.msra.gmra.mxu0 %vm137_vm0, %v3039_v16 }
0x102a   :  { %2581 = vmatprep.mubr.msk.f32.mxu0 %vm219_vm1, %v2966_v7 }
0x102b   :  { %v1480_v35 = vpop.permute.xlu1 %1479 }
0x10e9   :  { %v2565_v36 = vpop.f32.mrf.mxu0 }
0x10ea   :  { %v1555_v37 = vadd.f32 %v2565_v36, %v1480_v35 }
0x10eb   :  { %v1549_v38 = vpop.f32.mrf.mxu0 }
0x10ec   :  { %v1561_v39 = vmin.f32 %v1555_v37, 0.0  ;;  %v1550_v40 = vadd.f32 %v1549_v38, %v1478_v62  ;;  %vm1559_vm14 = vcmp.gt.f32.partialorder %v1555_v37, 0.0 }
0x10ee   :  { %v1564_v7 = vmul.f32 1.442695, %v1561_v39  ;;  %v1560_v41 = vmin.f32 %v1550_v40, 0.0  ;;  %vm1558_vm13 = vcmp.gt.f32.partialorder %v1550_v40, 0.0 }
0x10f0   :  { %2682 = vpow2.f32 %v1564_v7  ;;  %v1562_v42 = vmul.f32 1.442695, %v1560_v41 }
0x10f2   :  { %2684 = vpow2.f32 %v1562_v42 }
0x10fd   :  { %v2683_v20 = vpop.eup %2682 }
0x10fe   :  { %v2354_v44 = vadd.f32 -1.0, %v2683_v20 }
0x10ff   :  { %v2685_v43 = vpop.eup %2684 }
0x1100   :  { %v2353_v45 = vadd.f32 -1.0, %v2685_v43  ;;  %v1569_v46 = vsel %vm1559_vm14, %v1555_v37, %v2354_v44 }
0x1102   :  { %v1568_v21 = vsel %vm1558_vm13, %v1550_v40, %v2353_v45 }
0x1103   :  { %2574 = vmatprep.mubr.msk.f32.mxu1 %vm880_vm8, %v1568_v21 }
0x1104   :  { %2575 = vmatmul.mubr.msk.f32.vlgmr.msra.gmra.mxu1 %vm880_vm8, %v1569_v46 }
0x1105   :  { %2593 = vmatprep.mubr.msk.f32.mxu1 %vm219_vm1, %v2962_v5 }
0x11c4   :  { %v3155_v47 = vpop.f32.mrf.mxu1 }
0x11c5   :  { %1736 = vrot.lane.b32.xlu0 %v3155_v47, %s2872_s1  ;;  %2577 = vmatprep.subr.msk.mxu0 %vm226_vm2, %v3155_v47 }
0x11c6   :  { %v3160_v48 = vpop.f32.mrf.mxu1  ;;  %2578 = vmatpush3.msk.msra.mxu0 %vm226_vm2, %v3155_v47 }
0x11c7   :  { %1734 = vrot.lane.b32.xlu1 %v3160_v48, %s2872_s1  ;;  %2579 = vmatprep.subr.mxu0 %v3160_v48 }
0x11c8   :  { %2580 = vmatpush3.msra.mxu0 %v3160_v48 }
0x11c9   :  { %2582 = vmatmul.mubr.msk.f32.vlgmr.msra.gmra.mxu0 %vm219_vm1, %v2972_v9  ;;  %v2873_v9 = vmov 8  }
0x11ca   :  { %2588 = vmatprep.mubr.msk.f32.mxu0 %vm219_vm1, %v2962_v5  ;;  %2655 = vset.pattern.permute.xlu1 %v2873_v9 }
0x11cb   :  { %2656 = vset.pattern.permute.xlu0 %v2873_v9 }
0x1237   :  { %v1737_v49 = vpop.permute.xlu0 %1736 }
0x1238   :  { %2584 = vmatprep.subr.msk.mxu0 %vm226_vm2, %v1737_v49 }
0x1239   :  { %v1735_v50 = vpop.permute.xlu1 %1734  ;;  %2585 = vmatpush3.msk.msra.mxu0 %vm226_vm2, %v1737_v49 }
0x123a   :  { %2586 = vmatprep.subr.mxu0 %v1735_v50 }
0x123b   :  { %2587 = vmatpush3.msra.mxu0 %v1735_v50 }
0x123c   :  { %2589 = vmatmul.mubr.msk.f32.vlgmr.msra.gmra.mxu0 %vm219_vm1, %v2982_v12 }
0x123d   :  { %2600 = vmatprep.mubr.msk.f32.mxu0 %vm137_vm0, %v3035_v13 }
0x1289   :  { %v3177_v51 = vpop.f32.mrf.mxu0 }
0x128b   :  { %v3181_v52 = vpop.f32.mrf.mxu0 }
0x12fc   :  { %v2590_v53 = vpop.f32.mrf.mxu0 }
0x12fd   :  { %1820 = vrot.lane.b32.xlu1 %v2590_v53, %s2860_s14 }
0x12fe   :  { %v1807_v54 = vpop.f32.mrf.mxu0 }
0x12ff   :  { %1818 = vrot.lane.b32.xlu0 %v1807_v54, %s2860_s14 }
0x1301   :  { %1828 = vrot.lane.b32.xlu1 %v2994_v18, %s2856_s28 }
0x1303   :  { %1826 = vrot.lane.b32.xlu0 %v2986_v14, %s2856_s28  ;;  %s2875_s28 = smov 120  }
0x136f   :  { %v1821_v55 = vpop.permute.xlu1 %1820 }
0x1370   :  { %v1825_v59 = vadd.f32 %v3177_v51, %v1821_v55 }
0x1371   :  { %v1819_v56 = vpop.permute.xlu0 %1818 }
0x1372   :  { %v1824_v63 = vadd.f32 %v1819_v56, %v3181_v52 }
0x1373   :  { %v1829_v60 = vpop.permute.xlu1 %1828 }
0x1374   :  { %v1833_v0 = vadd.f32 %v1829_v60, %v1825_v59 }
0x1375   :  { %v1827_v1 = vpop.permute.xlu0 %1826 }
0x1376   :  { %v1837_v2 = vmul.f32 0.05, %v1833_v0  ;;  %v1832_v3 = vadd.f32 %v1827_v1, %v1824_v63  ;;  %vm1835_vm15 = vcmp.gt.f32.partialorder %v1833_v0, 0.0 }
0x1378   :  { %v1836_v4 = vmul.f32 0.05, %v1832_v3  ;;  %v1839_v6 = vsel %vm1835_vm15, %v1833_v0, %v1837_v2  ;;  %vm1834_vm3 = vcmp.gt.f32.partialorder %v1832_v3, 0.0 }
0x1379   :  { %1847 = vperm.xlu1 %2655, %v1839_v6  }
0x137a   :  { %v1838_v18 = vsel %vm1834_vm3, %v1832_v3, %v1836_v4 }
0x137b   :  { %1842 = vperm.xlu0 %2656, %v1838_v18  }
0x137d   :  { %2657 = vset.pattern.permute.xlu1 %v2874_v8 }
0x137e   :  { %1862 = vperm.xlu1 %2657, %v1838_v18  }
0x137f   :  { %2658 = vset.pattern.permute.xlu0 %v2874_v8 }
0x1380   :  { %1866 = vperm.xlu0 %2658, %v1839_v6  }
0x1384   :  { %2659 = vset.pattern.permute.xlu0 %v2873_v9 }
0x13f4   :  { %v1848_v14 = vpop.permute.xlu1 %1847 }
0x13f5   :  { %v1851_v10 = vsel %vm132_vm6, %v1848_v14, -1e+30 }
0x13f6   :  { %v1843_v11 = vpop.permute.xlu0 %1842  ;;  %v1853_v19 = vsel %vm219_vm1, %v1851_v10, -inf }
0x13f7   :  { %v1850_v17 = vsel %vm131_vm5, %v1843_v11, -1e+30 }
0x13f8   :  { %v1852_v22 = vsel %vm219_vm1, %v1850_v17, -inf }
0x13f9   :  { %v1854_v23 = vmax.f32 %v1852_v22, %v1853_v19  ;;  %v1863_v24 = vpop.permute.xlu1 %1862 }
0x13fa   :  { %v1869_v25 = vsel %vm131_vm5, %v1863_v24, -1e+30 }
0x13fb   :  { %v1855_v26 = vrot.slane %v1854_v23, 4  ;;  %v1867_v27 = vpop.permute.xlu0 %1866  ;;  %v1871_v30 = vsel %vm219_vm1, %v1869_v25, -inf }
0x13fc   :  { %v1870_v28 = vsel %vm132_vm6, %v1867_v27, -1e+30 }
0x13fd   :  { %v1856_v29 = vmax.f32 %v1854_v23, %v1855_v26  ;;  %v1872_v33 = vsel %vm219_vm1, %v1870_v28, -inf }
0x13fe   :  { %v1873_v15 = vmax.f32 %v1871_v30, %v1872_v33 }
0x13ff   :  { %v1857_v31 = vrot.slane %v1856_v29, 2 }
0x1400   :  { %v1874_v58 = vrot.slane %v1873_v15, 4 }
0x1401   :  { %v1858_v57 = vmax.f32 %v1856_v29, %v1857_v31 }
0x1402   :  { %v1875_v61 = vmax.f32 %v1873_v15, %v1874_v58 }
0x1403   :  { %v1859_v34 = vrot.slane %v1858_v57, 1 }
0x1404   :  { %v1876_v32 = vrot.slane %v1875_v61, 2 }
0x1405   :  { %v1860_v36 = vmax.f32 %v1858_v57, %v1859_v34 }
0x1406   :  { %v1877_v62 = vmax.f32 %v1875_v61, %v1876_v32 }
0x1408   :  { %v1878_v35 = vrot.slane %v1877_v62, 1 }
0x140a   :  { %v1879_v37 = vmax.f32 %v1877_v62, %v1878_v35 }
0x140c   :  { %v1880_v38 = vsel %vm460_vm7, %v1860_v36, %v1879_v37 }
0x140d   :  { %2591 = vmatprep.subr.msk.mxu1 %vm219_vm1, %v1880_v38 }
0x140e   :  { %2592 = vmatpush3.xpose.msk.msra.mxu1 %vm219_vm1, %v1880_v38 }
0x1411   :  { %2594 = vmatmul.mubr.msk.f32.vlgmr.msra.gmra.mxu1 %vm219_vm1, %v2982_v12 }
0x1412   :  { %2607 = vmatprep.mubr.msk.f32.mxu1 %vm219_vm1, %v2962_v5 }
0x14d1   :  { %v2595_v39 = vpop.f32.mrf.mxu1 }
0x14d2   :  { %1963 = vrot.lane.b32.xlu1 %v2595_v39, %s2860_s14 }
0x14d3   :  { %v1950_v40 = vpop.f32.mrf.mxu1 }
0x14d6   :  { %1961 = vrot.lane.b32.xlu1 %v1950_v40, %s2860_s14 }
0x1544   :  { %v1964_v7 = vpop.permute.xlu1 %1963 }
0x1545   :  { %v1968_v41 = vsub.f32 %v1839_v6, %v1964_v7 }
0x1547   :  { %v1971_v42 = vmul.f32 1.442695, %v1968_v41 }
0x1548   :  { %v1962_v20 = vpop.permute.xlu1 %1961 }
0x1549   :  { %2686 = vpow2.f32 %v1971_v42  ;;  %v1967_v43 = vsub.f32 %v1838_v18, %v1962_v20 }
0x154b   :  { %v1969_v44 = vmul.f32 1.442695, %v1967_v43 }
0x154d   :  { %2688 = vpow2.f32 %v1969_v44 }
0x1556   :  { %v2687_v45 = vpop.eup %2686 }
0x1557   :  { %1977 = vrot.lane.b32.xlu0 %v2687_v45, %s2875_s28 }
0x155a   :  { %v2689_v21 = vpop.eup %2688 }
0x155b   :  { %1975 = vrot.lane.b32.xlu1 %v2689_v21, %s2875_s28 }
0x15c9   :  { %v1978_v5 = vpop.permute.xlu0 %1977 }
0x15ca   :  { %2596 = vmatprep.subr.mxu0 %v1978_v5 }
0x15cb   :  { %2597 = vmatpush3.msra.mxu0 %v1978_v5 }
0x15cd   :  { %v1976_v46 = vpop.permute.xlu1 %1975 }
0x15ce   :  { %2598 = vmatprep.subr.mxu0 %v1976_v46 }
0x15cf   :  { %2599 = vmatpush3.msra.mxu0 %v1976_v46 }
0x15d0   :  { %2601 = vmatmul.mubr.msk.f32.vlgmr.msra.gmra.mxu0 %vm137_vm0, %v3039_v16 }
0x15d1   :  { %2614 = vmatprep.mubr.msk.f32.mxu0 %vm137_vm0, %v3035_v13 }
0x1690   :  { %v2602_v49 = vpop.f32.mrf.mxu0 }
0x1691   :  { %2603 = vmatprep.subr.msk.mxu1 %vm226_vm2, %v2602_v49 }
0x1692   :  { %v2047_v50 = vpop.f32.mrf.mxu0  ;;  %2604 = vmatpush3.msk.msra.mxu1 %vm226_vm2, %v2602_v49 }
0x1693   :  { %2605 = vmatprep.subr.mxu1 %v2047_v50 }
0x1694   :  { %2606 = vmatpush3.msra.mxu1 %v2047_v50 }
0x1695   :  { %2608 = vmatmul.mubr.msk.f32.vlgmr.msra.gmra.mxu1 %vm219_vm1, %v2982_v12  ;;  %vm2168_vm1 = vcmask 31744  }
0x1755   :  { %v2609_v53 = vpop.f32.mrf.mxu1 }
0x1756   :  { %v2131_v54 = vadd.f32 1e-16, %v2609_v53 }
0x1757   :  { %v2125_v55 = vpop.f32.mrf.mxu1 }
0x1758   :  { %v2126_v56 = vadd.f32 1e-16, %v2125_v55  ;;  %2138 = vrot.lane.b32.xlu0 %v2131_v54, %s2860_s14 }
0x175a   :  { %2136 = vrot.lane.b32.xlu1 %v2126_v56, %s2860_s14  ;;  %s2877_s14 = smov 124  }
0x17ca   :  { %v2139_v13 = vpop.permute.xlu0 %2138 }
0x17cb   :  { %2690 = vrcp.f32 %v2139_v13 }
0x17cc   :  { %v2137_v59 = vpop.permute.xlu1 %2136 }
0x17cd   :  { %2692 = vrcp.f32 %v2137_v59 }
0x17d8   :  { %v2691_v60 = vpop.eup %2690 }
0x17d9   :  { %v2145_v63 = vmul.f32 %v2691_v60, %v2687_v45 }
0x17da   :  { %v2693_v0 = vpop.eup %2692 }
0x17db   :  { %2153 = vperm.xlu0 %2659, %v2145_v63   ;;  %2163 = vperm.xlu1 %2657, %v2145_v63   ;;  %v2143_v1 = vmul.f32 %v2693_v0, %v2689_v21 }
0x17df   :  { %2661 = vset.pattern.permute.xlu0 %v2874_v8  ;;  %2660 = vset.pattern.permute.xlu1 %v2873_v9 }
0x17e0   :  { %2159 = vperm.xlu0 %2661, %v2143_v1   ;;  %2148 = vperm.xlu1 %2660, %v2143_v1  }
0x17e4   :  { %2171 = vrot.lane.b32.xlu1 %v3160_v48, %s2876_s17 }
0x17e8   :  { %2173 = vrot.lane.b32.xlu1 %v3155_v47, %s2876_s17 }
0x1856   :  { %v2154_v12 = vpop.permute.xlu0 %2153  ;;  %v2164_v2 = vpop.permute.xlu1 %2163 }
0x1857   :  { %v2157_v3 = vmul.f32 %v3177_v51, %v2154_v12  ;;  %v2167_v4 = vmul.f32 %v3177_v51, %v2164_v2 }
0x1859   :  { %v2170_v6 = vsel %vm2168_vm1, %v2157_v3, %v2167_v4 }
0x185a   :  { %2610 = vmatprep.subr.mxu0 %v2170_v6 }
0x185b   :  { %v2160_v18 = vpop.permute.xlu0 %2159  ;;  %2611 = vmatpush3.msra.mxu0 %v2170_v6  ;;  %v2149_v9 = vpop.permute.xlu1 %2148 }
0x185c   :  { %v2166_v8 = vmul.f32 %v2160_v18, %v3181_v52  ;;  %v2156_v14 = vmul.f32 %v2149_v9, %v3181_v52 }
0x185e   :  { %v2169_v48 = vsel %vm2168_vm1, %v2156_v14, %v2166_v8 }
0x185f   :  { %2612 = vmatprep.subr.mxu0 %v2169_v48  ;;  %v2172_v47 = vpop.permute.xlu1 %2171 }
0x1860   :  { %2613 = vmatpush3.msra.mxu0 %v2169_v48 }
0x1861   :  { %2615 = vmatmul.mubr.msk.f32.vlgmr.msra.gmra.mxu0 %vm137_vm0, %v3039_v16 }
0x1863   :  { %v2174_v10 = vpop.permute.xlu1 %2173 }
0x1921   :  { %v2616_v51 = vpop.f32.mrf.mxu0 }
0x1922   :  { %v2249_v11 = vadd.f32 %v2616_v51, %v2174_v10 }
0x1923   :  { %v2243_v17 = vpop.f32.mrf.mxu0 }
0x1924   :  { %v2255_v19 = vmin.f32 %v2249_v11, 0.0  ;;  %v2244_v22 = vadd.f32 %v2243_v17, %v2172_v47  ;;  %vm2253_vm2 = vcmp.gt.f32.partialorder %v2249_v11, 0.0 }
0x1926   :  { %v2258_v23 = vmul.f32 1.442695, %v2255_v19  ;;  %v2254_v24 = vmin.f32 %v2244_v22, 0.0  ;;  %vm2252_vm0 = vcmp.gt.f32.partialorder %v2244_v22, 0.0 }
0x1928   :  { %2694 = vpow2.f32 %v2258_v23  ;;  %v2256_v25 = vmul.f32 1.442695, %v2254_v24 }
0x192a   :  { %2696 = vpow2.f32 %v2256_v25 }
0x1935   :  { %v2695_v52 = vpop.eup %2694 }
0x1936   :  { %v2374_v26 = vadd.f32 -1.0, %v2695_v52 }
0x1937   :  { %v2697_v27 = vpop.eup %2696 }
0x1938   :  { %v2263_v28 = vsel %vm2253_vm2, %v2249_v11, %v2374_v26  ;;  %v2373_v29 = vadd.f32 -1.0, %v2697_v27 }
0x1939   :  { %2268 = vrot.lane.b32.xlu1 %v2263_v28, %s2877_s14 }
0x193a   :  { %v2262_v16 = vsel %vm2252_vm0, %v2244_v22, %v2373_v29 }
0x193b   :  { %2266 = vrot.lane.b32.xlu0 %v2262_v16, %s2877_s14 }
0x19ab   :  { %v2269_v30 = vpop.permute.xlu1 %2268 }
0x19ac   :  { %v2273_v33 = vadd.f32 %v2269_v30, %v2263_v28 }
0x19ad   :  { %v2267_v15 = vpop.permute.xlu0 %2266 }
0x19ae   :  { %v2275_v31 = vmul.f32 0.5, %v2273_v33  ;;  %v2272_v58 = vadd.f32 %v2267_v15, %v2262_v16 }
0x19b0   :  { %v2274_v57 = vmul.f32 0.5, %v2272_v58  ;;  %v2277_v61 = vmul.f32 %v2275_v31, %v2275_v31 }
0x19b2   :  { %v2282_v32 = vsel %vm2281_vm4, %v2277_v61, 0.0  ;;  %v2276_v34 = vmul.f32 %v2274_v57, %v2274_v57 }
0x19b3   :  { %2283 = vadd.xlane.f32.xlu1 %v2282_v32 }
0x19b4   :  { %v2278_v62 = vsel %vm2168_vm1, %v2276_v34, 0.0 }
0x19b5   :  { %2279 = vadd.xlane.f32.xlu0 %v2278_v62 }
0x1a3c   :  { %v2284_v35 = vpop.xlane.xlu1 %2283 }
0x1a3d   :  { %2698 = vrsqrt.f32 %v2284_v35  ;;  %vm2294_vm5 = vcmp.eq.f32.partialorder %v2284_v35, inf  ;;  %v2297_v40 = vand.u32 2147483648, %v2284_v35  ;;  %vm2296_vm6 = vcmp.eq.f32.partialorder %v2284_v35, 0.0 }
0x1a3e   :  { %v2280_v36 = vpop.xlane.xlu0 %2279 }
0x1a3f   :  { %2700 = vrsqrt.f32 %v2280_v36  ;;  %vm2287_vm7 = vcmp.eq.f32.partialorder %v2280_v36, inf  ;;  %v2290_v20 = vand.u32 2147483648, %v2280_v36  ;;  %vm2289_vm8 = vcmp.eq.f32.partialorder %v2280_v36, 0.0 }
0x1a4a   :  { %v2699_v37 = vpop.eup %2698 }
0x1a4b   :  { %v2293_v38 = vmul.f32 %v2699_v37, %v2284_v35 }
0x1a4c   :  { %v2701_v39 = vpop.eup %2700 }
0x1a4d   :  { %v2295_v7 = vsel %vm2294_vm5, %v2284_v35, %v2293_v38  ;;  %v2286_v41 = vmul.f32 %v2701_v39, %v2280_v36 }
0x1a4e   :  { %v2298_v42 = vsel %vm2296_vm6, %v2297_v40, %v2295_v7 }
0x1a4f   :  { %v2300_v43 = vmax.f32 %v2298_v42, 1e-12  ;;  %v2288_v44 = vsel %vm2287_vm7, %v2280_v36, %v2286_v41 }
0x1a50   :  { %v2291_v45 = vsel %vm2289_vm8, %v2290_v20, %v2288_v44 }
0x1a51   :  { %2702 = vrcp.f32 %v2300_v43  ;;  %v2299_v21 = vmax.f32 %v2291_v45, 1e-12 }
0x1a53   :  { %2704 = vrcp.f32 %v2299_v21 }
0x1a5e   :  { %v2703_v5 = vpop.eup %2702 }
0x1a5f   :  { %v2304_v46 = vmul.f32 %v2703_v5, %v2275_v31 }
0x1a60   :  { %v2705_v49 = vpop.eup %2704 }
0x1a61   :  { %2306 = vst.msk [vmem:[%s3254_s7 + $0x8] sm:$0xf] %vm2281_vm4, %v2304_v46  ;;  %v2302_v50 = vmul.f32 %v2705_v49, %v2274_v57 }
0x1a63   :  { %2305 = vst.msk [vmem:[%s3254_s7] sm:$0xff] %vm2168_vm1, %v2302_v50 }
0x1a64   :  { %2311 = vsyncpa [#allocation3], 1 }
0x1a65   :  { %2312 = vsyncpa [#allocation5], 1 }
0x1a66   :  { %2313 = vsyncpa [#allocation8], 1 }
0x1a67   :  { %2314 = vsyncpa [#allocation11], 1 }

</bundles_post_ra>
